<compile_context>
chip_gen: v7x
topology: tpu7x:2x2x1
jax: 0.10.0
libtpu: 0.0.40
codegen_flags: <defaults>
</compile_context>

<pallas_src>
from functools import partial

import jax
import jax.numpy as jnp
from jax.experimental import pallas as pl
from jax.experimental.pallas import tpu as pltpu

EMBED_DIM = 128
NUM_HEADS = 16
HEAD_DIM = EMBED_DIM // NUM_HEADS
SCALING = HEAD_DIM ** (-0.5)


def mha_kernel(x_ref, wqkv_ref, bqkv_ref, wo_ref, bo_ref, o_ref, *, b_blk, n_frames):
    H, D, E = NUM_HEADS, HEAD_DIM, EMBED_DIM
    T = n_frames

    x = x_ref[...]                                                   # (R, E) bf16

    # Fused Q/K/V projection: one MXU matmul (K=E, N=3E), bf16 operands, f32 accum.
    # (attention scaling already folded into the Q slice of wqkv/bqkv in the wrapper)
    qkv = jnp.dot(x, wqkv_ref[...], preferred_element_type=jnp.float32)
    qkv = qkv + bqkv_ref[...]                                        # (R, 3E) f32

    # Causal keep-mask built in-kernel (two iota compares, no HBM/VMEM mask buffer).
    row = jax.lax.broadcasted_iota(jnp.int32, (T, T), 0)
    col = jax.lax.broadcasted_iota(jnp.int32, (T, T), 1)
    keep = (col <= row)[None, :, :]                                  # (1, T, T)

    wo_h = wo_ref[...]                                               # (H, D, E) bf16

    for bi in range(b_blk):                                          # static unroll (b_blk is usually 1)
        # ---- per-batch attention on (T, T) tiles: no cross-batch score waste ----
        qkv_b = qkv[bi * T:(bi + 1) * T]                             # (T, 3E)
        qkv_b = qkv_b.reshape(T, 3 * H, D).transpose(1, 0, 2)        # (3H, T, D)
        q = qkv_b[:H].astype(jnp.bfloat16)                           # (H, T, D)
        k = qkv_b[H:2 * H].astype(jnp.bfloat16)                      # (H, T, D)
        v = qkv_b[2 * H:].astype(jnp.bfloat16)                       # (H, T, D)

        s = jnp.einsum('htd,hsd->hts', q, k,
                       preferred_element_type=jnp.float32)           # (H, T, T)

        # Sigmoid attention; mask applied after the sigmoid (identical to the -1e9
        # pre-fill: masked weights are exactly 0 either way, no inf intermediates).
        w = jnp.where(keep, jax.nn.sigmoid(s), 0.0)                  # (H, T, T)
        denom = jnp.sum(w, axis=-1, keepdims=True)                   # (H, T, 1), > 0 (diag kept)

        # PV matmul first, THEN the 1/denom row-scale on the (H, T, D) result —
        # normalization deferred past the matmul (T/D fewer elementwise ops).
        pv = jnp.einsum('hts,hsd->htd', w.astype(jnp.bfloat16), v,
                        preferred_element_type=jnp.float32)          # (H, T, D)
        pv = pv * pl.reciprocal(denom, approx=True)                  # (H, T, D)

        # Output projection with the head merge folded in: per-head (T,D)@(D,E)
        # batched matmul + head-sum — no explicit (H,T,D)->(T,E) relayout.
        out_h = jnp.einsum('htd,hde->hte', pv.astype(jnp.bfloat16), wo_h,
                           preferred_element_type=jnp.float32)       # (H, T, E)
        out_b = jnp.sum(out_h, axis=0) + bo_ref[...]                 # (T, E) f32

        if b_blk == 1:
            o_ref[...] = out_b.astype(o_ref.dtype)
        else:
            o_ref[bi * T:(bi + 1) * T, :] = out_b.astype(o_ref.dtype)


def _pick_batch_block(B, T, max_rows=256, min_grid_steps=2):
    """Largest divisor b_blk of B such that the block rows b_blk*T stay sublane
    aligned, fit the MXU M tile (<= max_rows), and leave >= min_grid_steps grid
    steps (so both v7x TensorCores get work). Attention is per-batch (T, T), so
    b_blk only widens the fused-projection M dimension."""
    if T % 8 != 0:
        # Block rows must be a multiple of 8 or equal the full array dim; fall back
        # to one full-array block. Safe now that scores scale with b_blk*H*T^2
        # (per-batch attention), not (b_blk*T)^2.
        return B
    best = 1
    for cand in range(1, B + 1):
        if B % cand:
            continue
        rows = cand * T
        steps = B // cand
        if rows <= max_rows and steps >= min_grid_steps:
            best = cand
    return best


def multi_head_attention(x, wq, bq, wk, bk, wv, bv, wo, bo):
    B, T, E = x.shape
    assert E == EMBED_DIM
    H, D = NUM_HEADS, HEAD_DIM

    # ---- One-time weight prep (grid-constant => done in the wrapper, not per step) ----
    # PyTorch Linear stores W as (out, in); pre-transpose so the kernel computes x @ W.
    # Fold the attention scaling into the Q projection, fuse Q/K/V into one matmul,
    # cast matmul weights to bf16 (MXU-native); biases stay f32.
    scaling = jnp.float32(SCALING)
    w_qkv = jnp.concatenate([wq.T * scaling, wk.T, wv.T], axis=1).astype(jnp.bfloat16)  # (E, 3E)
    b_qkv = jnp.concatenate([bq * scaling, bk, bv]).reshape(1, 3 * E).astype(jnp.float32)
    # Out-proj weight pre-transposed AND pre-split per head so the kernel's head merge
    # becomes a batched matmul + head-sum instead of an activation relayout.
    wo_h = wo.T.reshape(H, D, E).astype(jnp.bfloat16)                # (H, D, E)
    bo2 = bo.reshape(1, E).astype(jnp.float32)

    # ---- Batch blocking (projection M-dim only; attention is per-batch) ----
    b_blk = _pick_batch_block(B, T)
    R = b_blk * T
    grid = ((B * T) // R,)

    # Cast x to bf16 in the wrapper (kernel truncated it anyway): halves the HBM read.
    x2 = x.reshape(B * T, E).astype(jnp.bfloat16)

    kernel = partial(mha_kernel, b_blk=b_blk, n_frames=T)

    out2 = pl.pallas_call(
        kernel,
        out_shape=jax.ShapeDtypeStruct((B * T, E), x.dtype),
        grid=grid,
        in_specs=[
            pl.BlockSpec((R, E), lambda i: (i, 0)),          # x rows for this block (bf16)
            pl.BlockSpec((E, 3 * E), lambda i: (0, 0)),      # fused QKV weight (bf16)
            pl.BlockSpec((1, 3 * E), lambda i: (0, 0)),      # fused QKV bias (f32)
            pl.BlockSpec((H, D, E), lambda i: (0, 0, 0)),    # per-head out-proj weight (bf16)
            pl.BlockSpec((1, E), lambda i: (0, 0)),          # out-proj bias (f32)
        ],
        out_specs=pl.BlockSpec((R, E), lambda i: (i, 0)),    # lane-dense (last dim = 128)
        compiler_params=pltpu.CompilerParams(
            dimension_semantics=("parallel",),               # independent batch blocks (2 TCs on v7x)
            vmem_limit_bytes=32 * 1024 * 1024,
        ),
    )(x2, w_qkv, b_qkv, wo_h, bo2)
    return out2.reshape(B, T, E)


def mha_reference(x, wq, bq, wk, bk, wv, bv, wo, bo):
    """Pure-JAX f32 reference mirroring the PyTorch forward exactly."""
    B, T, E = x.shape
    q = (x @ wq.T + bq).reshape(B, T, NUM_HEADS, HEAD_DIM).transpose(0, 2, 1, 3)
    k = (x @ wk.T + bk).reshape(B, T, NUM_HEADS, HEAD_DIM).transpose(0, 2, 1, 3)
    v = (x @ wv.T + bv).reshape(B, T, NUM_HEADS, HEAD_DIM).transpose(0, 2, 1, 3)
    scores = jnp.einsum('bhtd,bhsd->bhts', q, k) * SCALING
    mask = jnp.triu(jnp.ones((T, T), dtype=bool), k=1)[None, None]
    scores = jnp.where(mask, -1e9, scores)
    w = jax.nn.sigmoid(scores)
    w = w / jnp.sum(w, axis=-1, keepdims=True)
    attn = jnp.einsum('bhts,bhsd->bhtd', w, v)
    attn = attn.transpose(0, 2, 1, 3).reshape(B, T, E)
    return attn @ wo.T + bo


if __name__ == "__main__":
    B, T = 2, 8
    key = jax.random.PRNGKey(0)
    kx, kq, kbq, kk, kbk, kv, kbv, ko, kbo = jax.random.split(key, 9)

    scale = 1.0 / jnp.sqrt(jnp.float32(EMBED_DIM))
    x  = jax.random.normal(kx, (B, T, EMBED_DIM), dtype=jnp.float32)
    wq = jax.random.uniform(kq,  (EMBED_DIM, EMBED_DIM), jnp.float32, -scale, scale)
    bq = jax.random.uniform(kbq, (EMBED_DIM,),            jnp.float32, -scale, scale)
    wk = jax.random.uniform(kk,  (EMBED_DIM, EMBED_DIM), jnp.float32, -scale, scale)
    bk = jax.random.uniform(kbk, (EMBED_DIM,),            jnp.float32, -scale, scale)
    wv = jax.random.uniform(kv,  (EMBED_DIM, EMBED_DIM), jnp.float32, -scale, scale)
    bv = jax.random.uniform(kbv, (EMBED_DIM,),            jnp.float32, -scale, scale)
    wo = jax.random.uniform(ko,  (EMBED_DIM, EMBED_DIM), jnp.float32, -scale, scale)
    bo = jax.random.uniform(kbo, (EMBED_DIM,),            jnp.float32, -scale, scale)

    out = multi_head_attention(x, wq, bq, wk, bk, wv, bv, wo, bo)
    out = jax.block_until_ready(out)

    ref = mha_reference(x, wq, bq, wk, bk, wv, bv, wo, bo)
    assert out.shape == (B, T, EMBED_DIM)
    # bf16 MXU operands + approx reciprocal => relaxed tolerance vs the f32 reference.
    assert jnp.allclose(out, ref, atol=2e-2, rtol=2e-2), \
        f"max abs diff {jnp.max(jnp.abs(out - ref))}"

    print("KERNEL_OK")
</pallas_src>

<mosaic_0001>
module attributes {stable_mosaic.version = 11 : i64} {
  func.func @mha_kernel(%arg0: i32, %arg1: memref<8x128xbf16, #tpu.memory_space<vmem>>, %arg2: memref<128x384xbf16, #tpu.memory_space<vmem>>, %arg3: memref<1x384xf32, #tpu.memory_space<vmem>>, %arg4: memref<16x8x128xbf16, #tpu.memory_space<vmem>>, %arg5: memref<1x128xf32, #tpu.memory_space<vmem>>, %arg6: memref<8x128xf32, #tpu.memory_space<vmem>>) attributes {dimension_semantics = [#tpu.dimension_semantics<parallel>], iteration_bounds = array<i64: 2>, scalar_prefetch = 0 : i64, scratch_operands = 0 : i64, tpu.core_type = #tpu.core_type<tc>, window_params = [{transform_indices = @transform_0, window_bounds = array<i64: 8, 128>}, {pipeline_mode = #tpu.pipeline_mode<synchronous>, transform_indices = @transform_1, window_bounds = array<i64: 128, 384>}, {pipeline_mode = #tpu.pipeline_mode<synchronous>, transform_indices = @transform_2, window_bounds = array<i64: 1, 384>}, {pipeline_mode = #tpu.pipeline_mode<synchronous>, transform_indices = @transform_3, window_bounds = array<i64: 16, 8, 128>}, {pipeline_mode = #tpu.pipeline_mode<synchronous>, transform_indices = @transform_4, window_bounds = array<i64: 1, 128>}, {transform_indices = @transform_5, window_bounds = array<i64: 8, 128>}]} {
    %c0 = arith.constant 0 : index
    %c0_0 = arith.constant 0 : index
    %0 = vector.load %arg1[%c0, %c0_0] : memref<8x128xbf16, #tpu.memory_space<vmem>>, vector<8x128xbf16>
    %c0_1 = arith.constant 0 : index
    %c0_2 = arith.constant 0 : index
    %1 = vector.load %arg2[%c0_1, %c0_2] : memref<128x384xbf16, #tpu.memory_space<vmem>>, vector<128x384xbf16>
    %cst = arith.constant dense<0.000000e+00> : vector<8x384xf32>
    %2 = tpu.matmul %0, %1, %cst {dimension_numbers = #tpu.dot_dimension_numbers<[1], [0], [0], [1], [0, 0, 1, 1], [], []>} : vector<8x128xbf16>, vector<128x384xbf16>, vector<8x384xf32> -> vector<8x384xf32>
    %c0_3 = arith.constant 0 : index
    %c0_4 = arith.constant 0 : index
    %3 = vector.load %arg3[%c0_3, %c0_4] : memref<1x384xf32, #tpu.memory_space<vmem>>, vector<1x384xf32>
    %4 = vector.broadcast %3 : vector<1x384xf32> to vector<8x384xf32>
    %5 = arith.addf %2, %4 : vector<8x384xf32>
    %6 = tpu.iota {dimensions = array<i32: 0>} : vector<8x8xi32>
    %7 = tpu.iota {dimensions = array<i32: 1>} : vector<8x8xi32>
    %8 = arith.cmpi sle, %7, %6 : vector<8x8xi32>
    %9 = vector.shape_cast %8 : vector<8x8xi1> to vector<1x8x8xi1>
    %c0_5 = arith.constant 0 : index
    %c0_6 = arith.constant 0 : index
    %c0_7 = arith.constant 0 : index
    %10 = vector.load %arg4[%c0_5, %c0_6, %c0_7] : memref<16x8x128xbf16, #tpu.memory_space<vmem>>, vector<16x8x128xbf16>
    %11 = vector.shape_cast %5 : vector<8x384xf32> to vector<8x48x8xf32>
    %12 = tpu.transpose %11, [1, 0, 2] : vector<8x48x8xf32> -> vector<48x8x8xf32>
    %13 = vector.extract_strided_slice %12 {offsets = [0, 0, 0], sizes = [16, 8, 8], strides = [1, 1, 1]} : vector<48x8x8xf32> to vector<16x8x8xf32>
    %14 = arith.truncf %13 : vector<16x8x8xf32> to vector<16x8x8xbf16>
    %15 = vector.extract_strided_slice %12 {offsets = [16, 0, 0], sizes = [16, 8, 8], strides = [1, 1, 1]} : vector<48x8x8xf32> to vector<16x8x8xf32>
    %16 = arith.truncf %15 : vector<16x8x8xf32> to vector<16x8x8xbf16>
    %17 = vector.extract_strided_slice %12 {offsets = [32, 0, 0], sizes = [16, 8, 8], strides = [1, 1, 1]} : vector<48x8x8xf32> to vector<16x8x8xf32>
    %18 = arith.truncf %17 : vector<16x8x8xf32> to vector<16x8x8xbf16>
    "tpu.trace_start"() <{level = 10 : i32, message = "htd,hsd->hts"}> : () -> ()
    %cst_8 = arith.constant dense<0.000000e+00> : vector<16x8x8xf32>
    %19 = tpu.matmul %14, %16, %cst_8 {dimension_numbers = #tpu.dot_dimension_numbers<[2], [2], [1], [1], [0, 0, 0, 1, 1, 1], [0], [0]>} : vector<16x8x8xbf16>, vector<16x8x8xbf16>, vector<16x8x8xf32> -> vector<16x8x8xf32>
    "tpu.trace_stop"() : () -> ()
    %20 = arith.negf %19 : vector<16x8x8xf32>
    %21 = math.exp %20 : vector<16x8x8xf32>
    %cst_9 = arith.constant 1.000000e+00 : f32
    %22 = vector.broadcast %cst_9 : f32 to vector<16x8x8xf32>
    %23 = arith.addf %22, %21 : vector<16x8x8xf32>
    %24 = arith.divf %22, %23 : vector<16x8x8xf32>
    %cst_10 = arith.constant 0.000000e+00 : f32
    %25 = vector.shape_cast %9 : vector<1x8x8xi1> to vector<1x8x8xi1>
    %26 = vector.broadcast %25 : vector<1x8x8xi1> to vector<16x8x8xi1>
    %27 = vector.broadcast %cst_10 : f32 to vector<16x8x8xf32>
    %28 = arith.select %26, %24, %27 : vector<16x8x8xi1>, vector<16x8x8xf32>
    %cst_11 = arith.constant dense<0.000000e+00> : vector<16x8xf32>
    %29 = vector.multi_reduction <add>, %28, %cst_11 [2] : vector<16x8x8xf32> to vector<16x8xf32>
    %30 = vector.shape_cast %29 : vector<16x8xf32> to vector<16x8x1xf32>
    %31 = arith.truncf %28 : vector<16x8x8xf32> to vector<16x8x8xbf16>
    "tpu.trace_start"() <{level = 10 : i32, message = "hts,hsd->htd"}> : () -> ()
    %cst_12 = arith.constant dense<0.000000e+00> : vector<16x8x8xf32>
    %32 = tpu.matmul %31, %18, %cst_12 {dimension_numbers = #tpu.dot_dimension_numbers<[2], [1], [1], [2], [0, 0, 0, 1, 1, 2], [0], [0]>} : vector<16x8x8xbf16>, vector<16x8x8xbf16>, vector<16x8x8xf32> -> vector<16x8x8xf32>
    "tpu.trace_stop"() : () -> ()
    %33 = tpu.reciprocal %30 {approx = true} : vector<16x8x1xf32> -> vector<16x8x1xf32>
    %34 = vector.broadcast %33 : vector<16x8x1xf32> to vector<16x8x8xf32>
    %35 = arith.mulf %32, %34 : vector<16x8x8xf32>
    %36 = arith.truncf %35 : vector<16x8x8xf32> to vector<16x8x8xbf16>
    "tpu.trace_start"() <{level = 10 : i32, message = "htd,hde->hte"}> : () -> ()
    %cst_13 = arith.constant dense<0.000000e+00> : vector<16x8x128xf32>
    %37 = tpu.matmul %36, %10, %cst_13 {dimension_numbers = #tpu.dot_dimension_numbers<[2], [1], [1], [2], [0, 0, 0, 1, 1, 2], [0], [0]>} : vector<16x8x8xbf16>, vector<16x8x128xbf16>, vector<16x8x128xf32> -> vector<16x8x128xf32>
    "tpu.trace_stop"() : () -> ()
    %cst_14 = arith.constant dense<0.000000e+00> : vector<8x128xf32>
    %38 = vector.multi_reduction <add>, %37, %cst_14 [0] : vector<16x8x128xf32> to vector<8x128xf32>
    %c0_15 = arith.constant 0 : index
    %c0_16 = arith.constant 0 : index
    %39 = vector.load %arg5[%c0_15, %c0_16] : memref<1x128xf32, #tpu.memory_space<vmem>>, vector<1x128xf32>
    %40 = vector.broadcast %39 : vector<1x128xf32> to vector<8x128xf32>
    %41 = arith.addf %38, %40 : vector<8x128xf32>
    %c0_17 = arith.constant 0 : index
    %c0_18 = arith.constant 0 : index
    %42 = vector.load %arg6[%c0_17, %c0_18] : memref<8x128xf32, #tpu.memory_space<vmem>>, vector<8x128xf32>
    tpu.vector_store %arg6[%c0_17, %c0_18], %41 {strides = array<i32>} : memref<8x128xf32, #tpu.memory_space<vmem>>, vector<8x128xf32>,
    return
  }
  func.func @transform_0(%arg0: i32) -> (i32, i32) {
    %c0_i32 = arith.constant 0 : i32
    %c0_i32_0 = arith.constant 0 : i32
    return %arg0, %c0_i32 : i32, i32
  }
  func.func @transform_1(%arg0: i32) -> (i32, i32) {
    %c0_i32 = arith.constant 0 : i32
    %c0_i32_0 = arith.constant 0 : i32
    %c0_i32_1 = arith.constant 0 : i32
    return %c0_i32, %c0_i32_0 : i32, i32
  }
  func.func @transform_2(%arg0: i32) -> (i32, i32) {
    %c0_i32 = arith.constant 0 : i32
    %c0_i32_0 = arith.constant 0 : i32
    %c0_i32_1 = arith.constant 0 : i32
    return %c0_i32, %c0_i32_0 : i32, i32
  }
  func.func @transform_3(%arg0: i32) -> (i32, i32, i32) {
    %c0_i32 = arith.constant 0 : i32
    %c0_i32_0 = arith.constant 0 : i32
    %c0_i32_1 = arith.constant 0 : i32
    %c0_i32_2 = arith.constant 0 : i32
    return %c0_i32, %c0_i32_0, %c0_i32_1 : i32, i32, i32
  }
  func.func @transform_4(%arg0: i32) -> (i32, i32) {
    %c0_i32 = arith.constant 0 : i32
    %c0_i32_0 = arith.constant 0 : i32
    %c0_i32_1 = arith.constant 0 : i32
    return %c0_i32, %c0_i32_0 : i32, i32
  }
  func.func @transform_5(%arg0: i32) -> (i32, i32) {
    %c0_i32 = arith.constant 0 : i32
    %c0_i32_0 = arith.constant 0 : i32
    return %arg0, %c0_i32 : i32, i32
  }
}

</mosaic_0001>

<bundles_post_ra>
// kernel: tpu_custom_call.1
= control target key start
LH: loop header
LB: loop body
LE: loop exit
PB: predicated region body
PF: predicated region fallthrough
CT: control target
= control target key end

     0   :  { %10 = vsyncpa [#allocation3], 0  ;;  %s7023_s0 = inlined_call_operand.hbm [shape: bf16[16,128], index: 0, kind: input, shape index: {}]   ;;  %s7024_s1 = inlined_call_operand.hbm [shape: bf16[128,384], index: 1, kind: input, shape index: {}]   ;;  %s7025_s2 = inlined_call_operand.vmem [shape: f32[1,384], index: 2, kind: input, shape index: {}]   ;;  %s7026_s3 = inlined_call_operand.hbm [shape: bf16[16,8,128], index: 3, kind: input, shape index: {}]   ;;  %s7027_s4 = inlined_call_operand.vmem [shape: f32[1,128], index: 4, kind: input, shape index: {}]   ;;  %s7028_s5 = inlined_call_operand.hbm [shape: f32[16,128], index: 5, kind: output, shape index: {}]  }
   0x1   :  { %12 = vsyncpa [#allocation3 + $0x1], 0 }
   0x2   :  { %13 = vsyncpa [#allocation6], 0 }
   0x3   :  { %14 = vsyncpa [#allocation4], 0 }
   0x4   :  { %16 = vsyncpa [#allocation4 + $0x1], 0  ;;  %s5932_s18 = smov 0   ;;  %s5934_s19 = smov 0  }
   0x5   :  { %s5936_s20 = smov 0   ;;  %s5938_s21 = smov 0  }
   0x6 LB: > { %s5953_s22 = sadd.s32 4294967295, %s5872_s21   ;;  %s4931_s23 = sadd.s32 4294967294, %s5872_s21   ;;  %s5872_s21 = sphi %s5938_s21, %s7050_s21   ;;  %s5868_s20 = sphi %s5936_s20, %s7049_s20   ;;  %s5864_s19 = sphi %s5934_s19, %s7048_s19   ;;  %s5860_s18 = sphi %s5932_s18, %s7047_s18  }
   0x7   : > { %p42_p0 = scmp.ne.s32.totalorder %s5864_s19, %s5860_s18  ;;  %p7029_p1 = scmp.eq.s32.totalorder %s5953_s22, 0 }
   0x8   : > { %p156_p3 = scmp.eq.s32.totalorder %s4931_s23, 1  ;;  %p4932_p5 = scmp.ge.s32.totalorder %s5872_s21, 1 }
   0x9   : > { %p5962_p4 = por %p7029_p1, %p42_p0  ;;  %p163_p7 = scmp.lt.s32.totalorder %s5872_s21, 3 }
   0xa   : > { %p5967_p6 = por %p156_p3, %p42_p0  ;;  %s5874_s27 = smov [#allocation5]  }
   0xb   : > { %s7032_s24 = scalar_select %p5962_p4, 1, 0 }
   0xc   : > { %s7033_s25 = scalar_select %p5967_p6, 1, 0 }
   0xd   : > { %p5972_p8 = pnand %p4932_p5, %p163_p7  ;;  %s175_s28 = sshll.u32 %s5874_s27, 4  ;;  %s5976_s28 = int_to_ptr.vmem [resolvable:$true] %s175_s28 }
   0xe   : > { %s5875_s30 = smov [#allocation7]   ;;  %s5716_s9 = scalar_lea.hbm %s7024_s1, 3072 }
   0xf   : > { %p5509_p9 = pneg %p5972_p8  ;;  %s191_s6 = sshll.u32 %s5875_s30, 4  ;;  %s5987_s6 = int_to_ptr.vmem [resolvable:$true] %s191_s6 }
  0x10   : > { %p5717_p12 = scmp.ne.s32.totalorder %s7024_s1, %s5716_s9  ;;  %p5723_p5 = scmp.lt.u32.totalorder %s5716_s9, %s7024_s1 }
  0x11   : > { %p5983_p11 = pnand %p5509_p9, %p7029_p1 }
  0x13   : > { %p5718_p13 = pneg %p5983_p11 }
  0x15   : > { %p5719_p0 = pnand %p5718_p13, %p5717_p12 }
  0x17   : > { %p5720_p3 = pneg %p5719_p0 }
  0x19   : > { %p5725_p7 = pnand %p5723_p5, %p5720_p3 }
  0x1b   : > { %5728 = shalt.err (!%p5725_p7)
}
  0x1c   : > { %s5729_s14 = scalar_lea.vmem %s5976_s28, 3072  ;;  %p5737_p2 = scmp.lt.s32.totalorder %s5976_s28, %s5976_s28 }
  0x1d   : > { %p5730_p9 = scmp.ne.s32.totalorder %s5976_s28, %s5729_s14  ;;  %p5738_p12 = scmp.lt.s32.totalorder %s5729_s14, %s5729_s14 }
  0x1f   : > { %p5732_p10 = pnand %p5730_p9, %p5718_p13  ;;  %p5739_p0 = por %p5738_p12, %p5737_p2 }
  0x21   : > { %p5733_p1 = pneg %p5732_p10 }
  0x23   : > { %p5740_p6 = pnand %p5739_p0, %p5733_p1 }
  0x25   : > { %5743 = shalt.err (!%p5740_p6)
}
  0x26   : > { %s5876_s15 = smov 192   ;;  %s5877_s16 = smov 12  }
  0x27   : > { %5512 = dma.hbm_to_vmem [thread:$0]  (!%p5983_p11), %s7024_s1, 3072, %s5976_s28, [#allocation6], %s5876_s15, %s5876_s15, %s5877_s16  }
  0x28   : > { %s5744_s7 = scalar_lea.hbm %s7026_s3, 1024 }
  0x29   : > { %p5745_p2 = scmp.ne.s32.totalorder %s7026_s3, %s5744_s7  ;;  %p5751_p10 = scmp.lt.u32.totalorder %s5744_s7, %s7026_s3 }
  0x2b   : > { %p5747_p1 = pnand %p5745_p2, %p5718_p13 }
  0x2d   : > { %p5748_p6 = pneg %p5747_p1 }
  0x2f   : > { %p5753_p3 = pnand %p5751_p10, %p5748_p6 }
  0x31   : > { %5756 = shalt.err (!%p5753_p3)
}
  0x32   : > { %s5757_s28 = scalar_lea.vmem %s5987_s6, 1024  ;;  %p5765_p12 = scmp.lt.s32.totalorder %s5987_s6, %s5987_s6 }
  0x33   : > { %p5758_p5 = scmp.ne.s32.totalorder %s5987_s6, %s5757_s28  ;;  %p5766_p0 = scmp.lt.s32.totalorder %s5757_s28, %s5757_s28 }
  0x35   : > { %p5760_p7 = pnand %p5758_p5, %p5718_p13  ;;  %p5767_p2 = por %p5766_p0, %p5765_p12 }
  0x37   : > { %p5761_p9 = pneg %p5760_p7 }
  0x39   : > { %p5768_p1 = pnand %p5767_p2, %p5761_p9 }
  0x3b   : > { %5771 = shalt.err (!%p5768_p1)
}
  0x3c   : > { %s5878_s12 = smov 64   ;;  %s5879_s13 = smov 4  }
  0x3d   : > { %5515 = dma.hbm_to_vmem [thread:$0]  (!%p5983_p11), %s7026_s3, 1024, %s5987_s6, [#allocation6], %s5878_s12, %s5878_s12, %s5879_s13  }
  0x3e   : > { %s6042_s16 = sadd.s32 1, %s5872_s21   ;;  %s29_s23 = sadd.s32 1, %s5868_s20 }
  0x3f   : > { %s26_s17 = ssub.s32 %s5872_s21, %s6042_s16  ;;  %p36_p6 = scmp.ne.s32.totalorder %s5868_s20, %s5864_s19 }
  0x40   : > { %p27_p13 = scmp.eq.s32.totalorder %s26_s17, 0  ;;  %p37_p10 = scmp.eq.s32.totalorder %s5872_s21, 0 }
  0x41   : > { %p7036_p5 = scmp.eq.s32.totalorder %s5953_s22, 1  ;;  %p5526_p9 = scmp.lt.s32.totalorder %s5872_s21, 2 }
  0x42   : > { %s6051_s27 = scalar_select %p27_p13, %s5868_s20, %s29_s23  }
  0x43   : > { %p38_p3 = por %p37_p10, %p36_p6  ;;  %p6055_p7 = por %p7036_p5, %p36_p6 }
  0x44   : > { %s208_s29 = sand.u32 1, %s5868_s20   ;;  %s4937_s6 = sshll.u32 %s5872_s21, 6 }
  0x45   : > { %s7037_s30 = scalar_select %p6055_p7, 1, 0 }
  0x46   : > { %s4936_s7 = sshll.u32 %s208_s29, 2  ;;  %s6065_s10 = scalar_lea.hbm %s7023_s0, %s4937_s6 }
  0x47   : > { %s212_s11 = scalar_lea.vmem [#allocation2], %s4936_s7  ;;  %p6069_p11 = pnand %p5526_p9, %p38_p3 }
  0x48   : > { %s219_s28 = sshll.u32 %s212_s11, 4  ;;  %s209_s13 = scalar_lea.sflag [#allocation3], %s208_s29  ;;  %s6067_s28 = int_to_ptr.vmem [resolvable:$true] %s219_s28 }
  0x49   : > { %s5772_s14 = scalar_lea.hbm %s6065_s10, 64  ;;  %p5774_p0 = pneg %p6069_p11 }
  0x4a   : > { %p5773_p12 = scmp.ne.s32.totalorder %s6065_s10, %s5772_s14  ;;  %s5777_s23 = scalar_lea.hbm %s7023_s0, 128 }
  0x4b   : > { %p5778_p13 = scmp.lt.u32.totalorder %s6065_s10, %s7023_s0  ;;  %p5779_p6 = scmp.lt.u32.totalorder %s5777_s23, %s5772_s14 }
  0x4c   : > { %p5775_p2 = pnand %p5774_p0, %p5773_p12  ;;  %p5781_p3 = scmp.lt.u32.totalorder %s5772_s14, %s6065_s10 }
  0x4d   : > { %p5780_p10 = por %p5779_p6, %p5778_p13 }
  0x4e   : > { %p5776_p1 = pneg %p5775_p2 }
  0x4f   : > { %p5782_p5 = por %p5781_p3, %p5780_p10 }
  0x51   : > { %p5783_p9 = pnand %p5782_p5, %p5776_p1 }
  0x53   : > { %5786 = shalt.err (!%p5783_p9)
}
  0x54   : > { %s5787_s29 = scalar_lea.vmem %s6067_s28, 64  ;;  %s5880_s8 = smov [#allocation2]  }
  0x55   : > { %p5788_p12 = scmp.ne.s32.totalorder %s6067_s28, %s5787_s29  ;;  %s5792_s9 = sshll.u32 %s5880_s8, 4  ;;  %s5793_s9 = int_to_ptr.vmem [resolvable:$false] %s5792_s9 }
  0x56   : > { %s5794_s11 = scalar_lea.vmem %s5793_s9, 128  ;;  %p5795_p4 = scmp.lt.s32.totalorder %s6067_s28, %s5793_s9 }
  0x57   : > { %p5790_p2 = pnand %p5788_p12, %p5774_p0  ;;  %p5796_p13 = scmp.lt.s32.totalorder %s5794_s11, %s5787_s29 }
  0x59   : > { %p5791_p7 = pneg %p5790_p2  ;;  %p5797_p6 = por %p5796_p13, %p5795_p4 }
  0x5b   : > { %p5798_p10 = pnand %p5797_p6, %p5791_p7 }
  0x5d   : > { %5801 = shalt.err (!%p5798_p10)
}
  0x5e   : > { %5519 = dma.hbm_to_vmem [thread:$0]  (!%p6069_p11), %s6065_s10, 64, %s6067_s28, %s209_s13  }
  0x5f   : > { %228 = sbr.rel (%p5972_p8) target bundleno = 1269 (0x4f5), region = 40  ;;  %s6101_s14 = sand.u32 (!%p5972_p8), 1, %s5864_s19  }
  0x60   : > { %s4939_s15 = sshll.u32 (!%p5972_p8), %s6101_s14, 2  ;;  %s231_s17 = scalar_lea.sflag (!%p5972_p8), [#allocation3], %s6101_s14 }
  0x61   : > { %s6105_s23 = scalar_lea.vmem (!%p5972_p8), [#allocation2], %s4939_s15  ;;  %p7039_p4 = scmp.ne.s32.totalorder (!%p5972_p8), %s7032_s24, 0 }
  0x66   : > { %5847 = dma.done.wait (%p7039_p4), %s231_s17, 64  }
  0x67   : > { %5849 = vsyncadd (%p7039_p4), %s231_s17, 4294967232  ;;  %p7040_p7 = scmp.eq.s32.totalorder %s5953_s22, 0 }
  0x69   : > { %5851 = dma.done.wait (%p7040_p7), [#allocation6], 4096   ;;  %p7041_p8 = pmov %p7040_p7 }
  0x6a   : > { %v5881_v0 = vmov 0   ;;  %v5882_v1 = vmov 0.0   ;;  %vm5883_vm0 = vmmov 0   ;;  %v5588_v2 = vld [vmem:[#allocation5 + $0x4] ss:$12 sps:$4 sm:$0xff]   ;;  %v305_v27 = vlaneseq  ;;  %s5884_s10 = smov 104  }
  0x6b   : > { %5853 = vsyncadd (%p7041_p8), [#allocation6], 4294963200  ;;  %480 = vmatprep.mubr.bf16.mxu0 %v5881_v0  ;;  %5189 = vmatprep.subr.bf16.mxu1 %v5882_v1  ;;  %v5590_v3 = vld [vmem:[#allocation5] ss:$12 sps:$4 sm:$0xff]   ;;  %v5591_v4 = vld [vmem:[#allocation5 + $0x1c] ss:$12 sps:$4 sm:$0xff]  }
  0x6c   : > { %5205 = vmatprep.mubr.msk.bf16.mxu1 %vm5883_vm0, %v5882_v1  ;;  %448 = vmatprep.subr.bf16.mxu0 %v5588_v2  ;;  %v5593_v5 = vld [vmem:[#allocation5 + $0x18] ss:$12 sps:$4 sm:$0xff]   ;;  %v5594_v6 = vld [vmem:[#allocation5 + $0x34] ss:$12 sps:$4 sm:$0xff]   ;;  %v5596_v7 = vld [vmem:[#allocation5 + $0x30] ss:$12 sps:$4 sm:$0xff]  }
  0x6d   : > { %449 = vmatpush1.bf16.msra.mxu0 %v5590_v3  ;;  %v5597_v8 = vld [vmem:[#allocation5 + $0x4c] ss:$12 sps:$4 sm:$0xff]   ;;  %v5599_v9 = vld [vmem:[#allocation5 + $0x48] ss:$12 sps:$4 sm:$0xff]   ;;  %v5600_v11 = vld [vmem:[#allocation5 + $0x64] ss:$12 sps:$4 sm:$0xff]  }
  0x6e   : > { %450 = vmatprep.subr.bf16.mxu0 %v5591_v4  ;;  %v5612_v10 = vld [vmem:[#allocation5 + $0x8] ss:$12 sps:$4 sm:$0xff]   ;;  %v5613_v12 = vld [vmem:[#allocation5 + $0x20] ss:$12 sps:$4 sm:$0xff]   ;;  %v5614_v15 = vld [vmem:[#allocation5 + $0x38] ss:$12 sps:$4 sm:$0xff]  }
  0x6f   : > { %5190 = vmatpush3.bf16.msra.mxu1 %v5612_v10  ;;  %v5602_v13 = vld [vmem:[#allocation5 + $0x60] ss:$12 sps:$4 sm:$0xff]   ;;  %v5603_v14 = vld [vmem:[#allocation5 + $0x7c] ss:$12 sps:$4 sm:$0xff]   ;;  %v5605_v16 = vld [vmem:[#allocation5 + $0x78] ss:$12 sps:$4 sm:$0xff]  }
  0x70   : > { %5191 = vmatprep.subr.bf16.mxu1 %v5882_v1  ;;  %v5606_v17 = vld [vmem:[#allocation5 + $0x94] ss:$12 sps:$4 sm:$0xff]   ;;  %v5615_v18 = vld [vmem:[#allocation5 + $0x50] ss:$12 sps:$4 sm:$0xff]   ;;  %v5609_v20 = vld [vmem:[#allocation5 + $0xac] ss:$12 sps:$4 sm:$0xff]  }
  0x71   : > { %451 = vmatpush1.bf16.msra.mxu0 %v5593_v5  ;;  %v5608_v19 = vld [vmem:[#allocation5 + $0x90] ss:$12 sps:$4 sm:$0xff]   ;;  %v5616_v21 = vld [vmem:[#allocation5 + $0x68] ss:$12 sps:$4 sm:$0xff]   ;;  %v5617_v23 = vld [vmem:[#allocation5 + $0x80] ss:$12 sps:$4 sm:$0xff]  }
  0x72   : > { %452 = vmatprep.subr.bf16.mxu0 %v5594_v6  ;;  %v5611_v22 = vld [vmem:[#allocation5 + $0xa8] ss:$12 sps:$4 sm:$0xff]   ;;  %v270_v24 = vld [vmem:[%s6105_s23] sm:$0xf]  ;;  %v6133_v28 = vshrl.u32 %v305_v27, 7  ;;  %s5885_s28 = smov 120  }
  0x73   : > { %5192 = vmatpush3.bf16.msra.mxu1 %v5613_v12  ;;  %v5618_v25 = vld [vmem:[#allocation5 + $0x98] ss:$12 sps:$4 sm:$0xff]   ;;  %v5619_v26 = vld [vmem:[#allocation5 + $0xb0] ss:$12 sps:$4 sm:$0xff]   ;;  %s5886_s12 = smov 112   ;;  %s5887_s13 = smov 96  }
  0x74   : > { %5193 = vmatprep.subr.bf16.mxu1 %v5882_v1  ;;  %v311_v29 = vsub.s32 1, %v6133_v28  ;;  %v303_v30 = vld [vmem:[%s7025_s2] sm:$0x7]  ;;  %v307_v31 = vsub.s32 0, %v6133_v28  ;;  %s5888_s7 = smov 88   ;;  %s5889_s6 = smov 80  }
  0x75   : > { %453 = vmatpush1.bf16.msra.mxu0 %v5596_v7  ;;  %s5890_s29 = smov 72   ;;  %s5891_s8 = smov 64   ;;  %v315_v44 = vsub.s32 2, %v6133_v28  ;;  %v5899_v47 = vmov 1983009808   ;;  %vm2368_vm1 = vcmask 64512  }
  0x76   : > { %454 = vmatprep.subr.bf16.mxu0 %v5597_v8  ;;  %v312_v32 = vrot.slane %v303_v30, %v311_v29  ;;  %v308_v35 = vrot.slane %v303_v30, %v307_v31  ;;  %s5892_s9 = smov 56   ;;  %s5893_s11 = smov 48   ;;  %v691_v48 = vunpack.c.l.s4 %v5899_v47  ;;  %v5900_v49 = vmov 1934713408  }
  0x77   : > { %5194 = vmatpush3.bf16.msra.mxu1 %v5614_v15  ;;  %s5894_s15 = smov 40   ;;  %s5895_s17 = smov 32   ;;  %v316_v45 = vrot.slane %v303_v30, %v315_v44  ;;  %v755_v50 = vunpack.c.l.s4 %v5900_v49  ;;  %vm3286_vm2 = vcmask 1043456  }
  0x78   : > { %5195 = vmatprep.subr.bf16.mxu1 %v5882_v1  ;;  %s5896_s23 = smov 24   ;;  %s5897_s24 = smov 16   ;;  %v692_v51 = vunpack.c.0.s8 %v691_v48 }
  0x79   : > { %455 = vmatpush1.bf16.msra.mxu0 %v5599_v9  ;;  %s5898_s26 = smov 8   ;;  %v756_v54 = vunpack.c.0.s8 %v755_v50  ;;  %p7044_p0 = scmp.ne.s32.totalorder %s7037_s30, 0 }
  0x7a   : > { %456 = vmatprep.subr.bf16.mxu0 %v5600_v11  ;;  %v6226_v55 = vsub.s32 %v692_v51, %v6133_v28 }
  0x7b   : > { %5196 = vmatpush3.bf16.msra.mxu1 %v5615_v18  ;;  %v6231_v62 = vsub.s32 %v756_v54, %v6133_v28 }
  0x7c   : > { %5197 = vmatprep.subr.bf16.mxu1 %v5882_v1 }
  0x7d   : > { %457 = vmatpush1.bf16.msra.mxu0 %v5602_v13 }
  0x7e   : > { %458 = vmatprep.subr.bf16.mxu0 %v5603_v14 }
  0x7f   : > { %5198 = vmatpush3.bf16.msra.mxu1 %v5616_v21 }
  0x80   : > { %5199 = vmatprep.subr.bf16.mxu1 %v5882_v1 }
  0x81   : > { %459 = vmatpush1.bf16.msra.mxu0 %v5605_v16 }
  0x82   : > { %460 = vmatprep.subr.bf16.mxu0 %v5606_v17 }
  0x83   : > { %5200 = vmatpush3.bf16.msra.mxu1 %v5617_v23 }
  0x84   : > { %5201 = vmatprep.subr.bf16.mxu1 %v5882_v1 }
  0x85   : > { %461 = vmatpush1.bf16.msra.mxu0 %v5608_v19 }
  0x86   : > { %462 = vmatprep.subr.bf16.mxu0 %v5609_v20 }
  0x87   : > { %5202 = vmatpush3.bf16.msra.mxu1 %v5618_v25 }
  0x88   : > { %5203 = vmatprep.subr.bf16.mxu1 %v5882_v1 }
  0x89   : > { %463 = vmatpush1.bf16.msra.mxu0 %v5611_v22 }
  0x8a   : > { %5209 = vmatprep.subr.bf16.mxu0 %v5882_v1 }
  0x8b   : > { %5204 = vmatpush3.bf16.msra.mxu1 %v5619_v26 }
  0x8c   : > { %481 = vmatmul.mubr.bf16.vlgmr.msra.gmra.mrb[0].mxu0 %v270_v24  ;;  %5215 = vmatprep.subr.bf16.mxu1 %v5882_v1 }
  0x8d   : > { %5211 = vmatprep.mubr.msk.bf16.mxu0 %vm5883_vm0, %v5882_v1 }
  0x8e   : > { %5206 = vmatmul.mubr.bf16.vlgmr.msra.gmra.mrb[0].mxu1 %v270_v24 }
  0x8f   : > { %5217 = vmatprep.mubr.msk.bf16.mxu1 %vm5883_vm0, %v5882_v1 }
 0x15f   : > { %v482_v33 = vpop.f32.mrb[0].mxu0 }
 0x160   : > { %v484_v34 = vpop.f32.mrb[1].mxu0  ;;  %v6146_v39 = vadd.f32 %v482_v33, %v308_v35 }
 0x161   : > { %v6140_v36 = vadd.f32 %v484_v34, %v312_v32  ;;  %v486_v37 = vpop.f32.mrb[2].mxu0  ;;  %v523_v40 = vpop.f32.mrb[0].mxu1 }
 0x162   : > { %v487_v38 = vpop.f32.mrb[3].mxu0  ;;  %v5207_v41 = vpop.f32.mrb[1].mxu1  ;;  %v6197_v46 = vadd.f32 %v523_v40, %v316_v45 }
 0x163   : > { %603 = vrot.lane.b32.xlu1 %v6140_v36, %s5884_s10  ;;  %597 = vrot.lane.b32.xlu0 %v6140_v36, %s5885_s28  ;;  %v526_v42 = vpop.f32.mrb[2].mxu1 }
 0x164   : > { %v5208_v43 = vpop.f32.mrb[3].mxu1 }
 0x167   : > { %600 = vrot.lane.b32.xlu0 %v6140_v36, %s5886_s12  ;;  %551 = vrot.lane.b32.xlu1 %v6146_v39, %s5885_s28 }
 0x16b   : > { %554 = vrot.lane.b32.xlu0 %v6146_v39, %s5886_s12  ;;  %557 = vrot.lane.b32.xlu1 %v6146_v39, %s5884_s10 }
 0x16f   : > { %606 = vrot.lane.b32.xlu0 %v6140_v36, %s5887_s13  ;;  %609 = vrot.lane.b32.xlu1 %v6140_v36, %s5888_s7 }
 0x173   : > { %612 = vrot.lane.b32.xlu0 %v6140_v36, %s5889_s6  ;;  %615 = vrot.lane.b32.xlu1 %v6140_v36, %s5890_s29 }
 0x177   : > { %560 = vrot.lane.b32.xlu0 %v6146_v39, %s5887_s13  ;;  %563 = vrot.lane.b32.xlu1 %v6146_v39, %s5888_s7 }
 0x17b   : > { %566 = vrot.lane.b32.xlu0 %v6146_v39, %s5889_s6  ;;  %569 = vrot.lane.b32.xlu1 %v6146_v39, %s5890_s29 }
 0x17f   : > { %618 = vrot.lane.b32.xlu0 %v6140_v36, %s5891_s8  ;;  %621 = vrot.lane.b32.xlu1 %v6140_v36, %s5892_s9 }
 0x183   : > { %624 = vrot.lane.b32.xlu0 %v6140_v36, %s5893_s11  ;;  %627 = vrot.lane.b32.xlu1 %v6140_v36, %s5894_s15 }
 0x187   : > { %572 = vrot.lane.b32.xlu0 %v6146_v39, %s5891_s8  ;;  %575 = vrot.lane.b32.xlu1 %v6146_v39, %s5892_s9 }
 0x18b   : > { %578 = vrot.lane.b32.xlu0 %v6146_v39, %s5893_s11  ;;  %581 = vrot.lane.b32.xlu1 %v6146_v39, %s5894_s15 }
 0x18f   : > { %630 = vrot.lane.b32.xlu0 %v6140_v36, %s5895_s17  ;;  %633 = vrot.lane.b32.xlu1 %v6140_v36, %s5896_s23 }
 0x193   : > { %636 = vrot.lane.b32.xlu0 %v6140_v36, %s5897_s24  ;;  %639 = vrot.lane.b32.xlu1 %v6140_v36, %s5898_s26 }
 0x197   : > { %584 = vrot.lane.b32.xlu0 %v6146_v39, %s5895_s17  ;;  %587 = vrot.lane.b32.xlu1 %v6146_v39, %s5896_s23 }
 0x19b   : > { %590 = vrot.lane.b32.xlu0 %v6146_v39, %s5897_s24  ;;  %593 = vrot.lane.b32.xlu1 %v6146_v39, %s5898_s26 }
 0x19f   : > { %643 = vrot.lane.b32.xlu0 %v6197_v46, %s5885_s28  ;;  %646 = vrot.lane.b32.xlu1 %v6197_v46, %s5886_s12 }
 0x1a3   : > { %649 = vrot.lane.b32.xlu0 %v6197_v46, %s5884_s10  ;;  %652 = vrot.lane.b32.xlu1 %v6197_v46, %s5887_s13  ;;  %s4942_s10 = sshll.u32 %s6101_s14, 3  ;;  %s5081_s13 = sshll.u32 %s5953_s22, 7 }
 0x1a7   : > { %655 = vrot.lane.b32.xlu0 %v6197_v46, %s5888_s7  ;;  %658 = vrot.lane.b32.xlu1 %v6197_v46, %s5889_s6  ;;  %s268_s7 = scalar_lea.vmem [#allocation8], %s4942_s10 }
 0x1a8   : > { %s4842_s6 = sshll.u32 %s268_s7, 4  ;;  %s6981_s6 = int_to_ptr.vmem [resolvable:$true] %s4842_s6 }
 0x1a9   : > { %s5802_s22 = scalar_lea.vmem %s6981_s6, 128 }
 0x1aa   : > { %p5803_p11 = scmp.ne.s32.totalorder %s6981_s6, %s5802_s22 }
 0x1ab   : > { %661 = vrot.lane.b32.xlu0 %v6197_v46, %s5890_s29  ;;  %664 = vrot.lane.b32.xlu1 %v6197_v46, %s5891_s8 }
 0x1ac   : > { %p5804_p1 = pnand %p5803_p11, %p7044_p0 }
 0x1ae   : > { %p5805_p3 = pneg %p5804_p1 }
 0x1af   : > { %667 = vrot.lane.b32.xlu0 %v6197_v46, %s5892_s9  ;;  %670 = vrot.lane.b32.xlu1 %v6197_v46, %s5893_s11  ;;  %s6979_s9 = scalar_lea.hbm %s7028_s5, %s5081_s13  ;;  %s4829_s11 = scalar_lea.sflag [#allocation4], %s6101_s14 }
 0x1b3   : > { %673 = vrot.lane.b32.xlu0 %v6197_v46, %s5894_s15  ;;  %676 = vrot.lane.b32.xlu1 %v6197_v46, %s5895_s17  ;;  %s5901_s15 = smov [#allocation8]  }
 0x1b4   : > { %s5806_s17 = sshll.u32 %s5901_s15, 4  ;;  %s5807_s17 = int_to_ptr.vmem [resolvable:$false] %s5806_s17 }
 0x1b5   : > { %p5809_p5 = scmp.lt.s32.totalorder %s6981_s6, %s5807_s17 }
 0x1b7   : > { %679 = vrot.lane.b32.xlu0 %v6197_v46, %s5896_s23  ;;  %682 = vrot.lane.b32.xlu1 %v6197_v46, %s5897_s24  ;;  %s5808_s23 = scalar_lea.vmem %s5807_s17, 256 }
 0x1b8   : > { %p5810_p9 = scmp.lt.s32.totalorder %s5808_s23, %s5802_s22 }
 0x1ba   : > { %p5811_p12 = por %p5810_p9, %p5809_p5 }
 0x1bb   : > { %685 = vrot.lane.b32.xlu0 %v6197_v46, %s5898_s26 }
 0x1bc   : > { %p5812_p2 = pnand %p5811_p12, %p5805_p3 }
 0x1d5   : > { %v604_v52 = vpop.permute.xlu1 %603  ;;  %v598_v53 = vpop.permute.xlu0 %597 }
 0x1d6   : > { %v976_v56 = vcombine.low %v598_v53, %v604_v52  ;;  %v977_v57 = vcombine.high %v598_v53, %v604_v52 }
 0x1d8   : > { %v984_v63 = vrot.slane %v976_v56, %v6226_v55  ;;  %v991_v0 = vrot.slane %v977_v57, %v6226_v55 }
 0x1d9   : > { %v601_v58 = vpop.permute.xlu0 %600  ;;  %v552_v59 = vpop.permute.xlu1 %551 }
 0x1da   : > { %v960_v60 = vcombine.low %v6140_v36, %v601_v58  ;;  %v961_v61 = vcombine.high %v6140_v36, %v601_v58 }
 0x1dc   : > { %v968_v2 = vrot.slane %v960_v60, %v6226_v55  ;;  %v975_v3 = vrot.slane %v961_v61, %v6226_v55 }
 0x1dd   : > { %v555_v4 = vpop.permute.xlu0 %554  ;;  %v558_v5 = vpop.permute.xlu1 %557 }
 0x1de   : > { %v1024_v6 = vcombine.low %v968_v2, %v984_v63  ;;  %v1025_v7 = vcombine.high %v968_v2, %v984_v63  ;;  %v1040_v8 = vcombine.low %v975_v3, %v991_v0  ;;  %v1041_v9 = vcombine.high %v975_v3, %v991_v0 }
 0x1df   : > { %v688_v10 = vcombine.low %v6146_v39, %v555_v4  ;;  %v689_v11 = vcombine.high %v6146_v39, %v555_v4  ;;  %v704_v12 = vcombine.low %v552_v59, %v558_v5  ;;  %v705_v13 = vcombine.high %v552_v59, %v558_v5 }
 0x1e0   : > { %v1032_v14 = vrot.slane %v1024_v6, %v6231_v62  ;;  %v1039_v15 = vrot.slane %v1025_v7, %v6231_v62  ;;  %v1048_v16 = vrot.slane %v1040_v8, %v6231_v62  ;;  %v1055_v17 = vrot.slane %v1041_v9, %v6231_v62 }
 0x1e1   : > { %v696_v18 = vrot.slane %v688_v10, %v6226_v55  ;;  %v703_v19 = vrot.slane %v689_v11, %v6226_v55  ;;  %v712_v20 = vrot.slane %v704_v12, %v6226_v55  ;;  %v719_v21 = vrot.slane %v705_v13, %v6226_v55  ;;  %v607_v22 = vpop.permute.xlu0 %606  ;;  %v610_v23 = vpop.permute.xlu1 %609 }
 0x1e2   : > { %v4983_v24 = vcombine.low %v1032_v14, %v1039_v15  ;;  %v4985_v25 = vcombine.high %v1032_v14, %v1039_v15  ;;  %v4987_v26 = vcombine.low %v1048_v16, %v1055_v17  ;;  %v4989_v29 = vcombine.high %v1048_v16, %v1055_v17 }
 0x1e3   : > { %v752_v30 = vcombine.low %v696_v18, %v712_v20  ;;  %v753_v31 = vcombine.high %v696_v18, %v712_v20  ;;  %v768_v32 = vcombine.low %v703_v19, %v719_v21  ;;  %v769_v33 = vcombine.high %v703_v19, %v719_v21 }
 0x1e4   : > { %v6248_v34 = vrot.slane %v4983_v24, %v6226_v55  ;;  %v6251_v35 = vrot.slane %v4985_v25, %v6226_v55  ;;  %v6254_v36 = vrot.slane %v4987_v26, %v6226_v55  ;;  %v6257_v37 = vrot.slane %v4989_v29, %v6226_v55 }
 0x1e5   : > { %v760_v38 = vrot.slane %v752_v30, %v6231_v62  ;;  %v767_v39 = vrot.slane %v753_v31, %v6231_v62  ;;  %v776_v40 = vrot.slane %v768_v32, %v6231_v62  ;;  %v783_v41 = vrot.slane %v769_v33, %v6231_v62  ;;  %v613_v42 = vpop.permute.xlu0 %612  ;;  %v616_v43 = vpop.permute.xlu1 %615 }
 0x1e6   : > { %v992_v44 = vcombine.low %v607_v22, %v613_v42  ;;  %v993_v45 = vcombine.high %v607_v22, %v613_v42  ;;  %v1008_v47 = vcombine.low %v610_v23, %v616_v43  ;;  %v1009_v48 = vcombine.high %v610_v23, %v616_v43 }
 0x1e7   : > { %v4967_v49 = vcombine.low %v760_v38, %v767_v39  ;;  %v4969_v50 = vcombine.high %v760_v38, %v767_v39  ;;  %v4971_v51 = vcombine.low %v776_v40, %v783_v41  ;;  %v4973_v52 = vcombine.high %v776_v40, %v783_v41 }
 0x1e8   : > { %v1000_v53 = vrot.slane %v992_v44, %v6226_v55  ;;  %v1007_v54 = vrot.slane %v993_v45, %v6226_v55  ;;  %v1016_v56 = vrot.slane %v1008_v47, %v6226_v55  ;;  %v1023_v57 = vrot.slane %v1009_v48, %v6226_v55 }
 0x1e9   : > { %v6268_v58 = vrot.slane %v4967_v49, %v6226_v55  ;;  %v6271_v59 = vrot.slane %v4969_v50, %v6226_v55  ;;  %v6274_v60 = vrot.slane %v4971_v51, %v6226_v55  ;;  %v6277_v61 = vrot.slane %v4973_v52, %v6226_v55  ;;  %v561_v63 = vpop.permute.xlu0 %560  ;;  %v564_v0 = vpop.permute.xlu1 %563 }
 0x1ea   : > { %v1056_v2 = vcombine.low %v1000_v53, %v1016_v56  ;;  %v1057_v3 = vcombine.high %v1000_v53, %v1016_v56  ;;  %v1072_v4 = vcombine.low %v1007_v54, %v1023_v57  ;;  %v1073_v5 = vcombine.high %v1007_v54, %v1023_v57 }
 0x1eb   : > { %v1568_v6 = vcombine.low %v6268_v58, %v6271_v59  ;;  %v1600_v7 = vcombine.low %v6274_v60, %v6277_v61  ;;  %v1569_v10 = vcombine.high %v6268_v58, %v6271_v59  ;;  %v1601_v11 = vcombine.high %v6274_v60, %v6277_v61 }
 0x1ec   : > { %v6284_v8 = vrot.slane %v1056_v2, %v6231_v62  ;;  %v6287_v9 = vrot.slane %v1057_v3, %v6231_v62  ;;  %v6294_v14 = vrot.slane %v1072_v4, %v6231_v62  ;;  %v1087_v15 = vrot.slane %v1073_v5, %v6231_v62 }
 0x1ed   : > { %v567_v12 = vpop.permute.xlu0 %566  ;;  %v570_v13 = vpop.permute.xlu1 %569  ;;  %v1840_v16 = vcombine.low %v6248_v34, %v6251_v35  ;;  %v1872_v17 = vcombine.low %v6254_v36, %v6257_v37  ;;  %v1576_v24 = vrot.slane %v1568_v6, %v6231_v62  ;;  %v1608_v25 = vrot.slane %v1600_v7, %v6231_v62 }
 0x1ee   : > { %v720_v18 = vcombine.low %v561_v63, %v567_v12  ;;  %v721_v19 = vcombine.high %v561_v63, %v567_v12  ;;  %v736_v20 = vcombine.low %v564_v0, %v570_v13  ;;  %v737_v21 = vcombine.high %v564_v0, %v570_v13 }
 0x1ef   : > { %v4984_v22 = vcombine.low %v6284_v8, %v6287_v9  ;;  %v4986_v23 = vcombine.high %v6284_v8, %v6287_v9  ;;  %v4988_v38 = vcombine.low %v6294_v14, %v1087_v15  ;;  %v4990_v39 = vcombine.high %v6294_v14, %v1087_v15 }
 0x1f0   : > { %v728_v26 = vrot.slane %v720_v18, %v6226_v55  ;;  %v735_v29 = vrot.slane %v721_v19, %v6226_v55  ;;  %v744_v30 = vrot.slane %v736_v20, %v6226_v55  ;;  %v751_v31 = vrot.slane %v737_v21, %v6226_v55 }
 0x1f1   : > { %v619_v32 = vpop.permute.xlu0 %618  ;;  %v622_v33 = vpop.permute.xlu1 %621  ;;  %v1848_v40 = vrot.slane %v1840_v16, %v6231_v62  ;;  %v1880_v41 = vrot.slane %v1872_v17, %v6231_v62  ;;  %v6316_v47 = vrot.slane %v4984_v22, %v6226_v55  ;;  %v1632_v50 = vcombine.low %v1576_v24, %v1608_v25 }
 0x1f2   : > { %v784_v42 = vcombine.low %v728_v26, %v744_v30  ;;  %v785_v43 = vcombine.high %v728_v26, %v744_v30  ;;  %v800_v44 = vcombine.low %v735_v29, %v751_v31  ;;  %v801_v45 = vcombine.high %v735_v29, %v751_v31 }
 0x1f3   : > { %v1904_v48 = vcombine.low %v1848_v40, %v1880_v41  ;;  %v1905_v49 = vcombine.high %v1848_v40, %v1880_v41  ;;  %v1633_v3 = vcombine.high %v1576_v24, %v1608_v25  ;;  %v1841_v22 = vcombine.high %v6248_v34, %v6251_v35 }
 0x1f4   : > { %v792_v51 = vrot.slane %v784_v42, %v6231_v62  ;;  %v799_v52 = vrot.slane %v785_v43, %v6231_v62  ;;  %v808_v53 = vrot.slane %v800_v44, %v6231_v62  ;;  %v815_v54 = vrot.slane %v801_v45, %v6231_v62 }
 0x1f5   : > { %v625_v56 = vpop.permute.xlu0 %624  ;;  %v628_v57 = vpop.permute.xlu1 %627  ;;  %v2336_v63 = vpack.c.bf16 %v1904_v48, %v1904_v48  ;;  %v2337_v0 = vpack.c.bf16 %v1905_v49, %v1905_v49  ;;  %v6341_v24 = vrot.slane %v4986_v23, %v6226_v55  ;;  %v6344_v25 = vrot.slane %v4988_v38, %v6226_v55 }
 0x1f6   : > { %v1096_v2 = vcombine.low %v619_v32, %v625_v56  ;;  %v4968_v4 = vcombine.low %v792_v51, %v799_v52  ;;  %v4970_v5 = vcombine.high %v792_v51, %v799_v52  ;;  %v4972_v6 = vcombine.low %v808_v53, %v815_v54 }
 0x1f7   : > { %v4974_v7 = vcombine.high %v808_v53, %v815_v54  ;;  %v2373_v8 = vsel %vm2368_vm1, %v2336_v63, 0  ;;  %v2419_v9 = vsel %vm2368_vm1, %v2337_v0, 0  ;;  %v1097_v12 = vcombine.high %v619_v32, %v625_v56 }
 0x1f8   : > { %v1104_v13 = vrot.slane %v1096_v2, %v6226_v55  ;;  %v6326_v14 = vrot.slane %v4968_v4, %v6226_v55  ;;  %v6329_v15 = vrot.slane %v4970_v5, %v6226_v55  ;;  %v6332_v16 = vrot.slane %v4972_v6, %v6226_v55  ;;  %5210 = vmatpush3.bf16.xpose.msra.mxu0 %v2373_v8 }
 0x1f9   : > { %v6335_v17 = vrot.slane %v4974_v7, %v6226_v55  ;;  %v573_v18 = vpop.permute.xlu0 %572  ;;  %v576_v19 = vpop.permute.xlu1 %575  ;;  %5216 = vmatpush3.bf16.xpose.msra.mxu1 %v2419_v9  ;;  %v1112_v20 = vcombine.low %v622_v33, %v628_v57  ;;  %v1113_v21 = vcombine.high %v622_v33, %v628_v57  ;;  %5221 = vmatprep.subr.bf16.mxu0 %v5882_v1 }
 0x1fa   : > { %v6347_v26 = vrot.slane %v4990_v39, %v6226_v55  ;;  %v2320_v29 = vpack.c.bf16 %v1632_v50, %v1632_v50  ;;  %5227 = vmatprep.subr.bf16.mxu1 %v5882_v1  ;;  %v1111_v30 = vrot.slane %v1097_v12, %v6226_v55  ;;  %v1873_v34 = vcombine.high %v6254_v36, %v6257_v37 }
 0x1fb   : > { %v1120_v31 = vrot.slane %v1112_v20, %v6226_v55  ;;  %v1127_v32 = vrot.slane %v1113_v21, %v6226_v55  ;;  %v1584_v35 = vcombine.low %v6326_v14, %v6329_v15  ;;  %v1585_v23 = vcombine.high %v6326_v14, %v6329_v15 }
 0x1fc   : > { %v2321_v33 = vpack.c.bf16 %v1633_v3, %v1633_v3  ;;  %v1855_v38 = vrot.slane %v1841_v22, %v6231_v62  ;;  %v1616_v41 = vcombine.low %v6332_v16, %v6335_v17  ;;  %v1617_v42 = vcombine.high %v6332_v16, %v6335_v17 }
 0x1fd   : > { %v579_v39 = vpop.permute.xlu0 %578  ;;  %v582_v40 = vpop.permute.xlu1 %581  ;;  %v1160_v43 = vcombine.low %v1104_v13, %v1120_v31  ;;  %v1161_v44 = vcombine.high %v1104_v13, %v1120_v31  ;;  %v1887_v36 = vrot.slane %v1873_v34, %v6231_v62  ;;  %v1176_v51 = vcombine.low %v1111_v30, %v1127_v32 }
 0x1fe   : > { %v824_v37 = vcombine.low %v573_v18, %v579_v39  ;;  %v825_v45 = vcombine.high %v573_v18, %v579_v39  ;;  %v840_v48 = vcombine.low %v576_v19, %v582_v40  ;;  %v1177_v52 = vcombine.high %v1111_v30, %v1127_v32 }
 0x1ff   : > { %v1168_v49 = vrot.slane %v1160_v43, %v6231_v62  ;;  %v1175_v50 = vrot.slane %v1161_v44, %v6231_v62  ;;  %5212 = vmatmul.mubr.msk.bf16.vlgmr.msra.gmra.mrb[4].mxu0 %vm2368_vm1, %v2320_v29  ;;  %v1906_v53 = vcombine.low %v1855_v38, %v1887_v36  ;;  %v1907_v54 = vcombine.high %v1855_v38, %v1887_v36 }
 0x200   : > { %5218 = vmatmul.mubr.msk.bf16.vlgmr.msra.gmra.mrb[4].mxu1 %vm2368_vm1, %v2321_v33  ;;  %v832_v56 = vrot.slane %v824_v37, %v6226_v55  ;;  %v1583_v57 = vrot.slane %v1569_v10, %v6231_v62  ;;  %v839_v0 = vrot.slane %v825_v45, %v6226_v55  ;;  %5223 = vmatprep.mubr.msk.bf16.mxu0 %vm5883_vm0, %v5882_v1 }
 0x201   : > { %v631_v63 = vpop.permute.xlu0 %630  ;;  %v1615_v2 = vrot.slane %v1601_v11, %v6231_v62  ;;  %v1856_v3 = vcombine.low %v6316_v47, %v6341_v24  ;;  %v1888_v4 = vcombine.low %v6344_v25, %v6347_v26  ;;  %v2338_v5 = vpack.c.bf16 %v1906_v53, %v1906_v53  ;;  %5229 = vmatprep.mubr.msk.bf16.mxu1 %vm5883_vm0, %v5882_v1  ;;  %v6388_v6 = vpop.permute.xlu1 %633 }
 0x202   : > { %v2339_v58 = vpack.c.bf16 %v1907_v54, %v1907_v54  ;;  %v841_v59 = vcombine.high %v576_v19, %v582_v40  ;;  %v848_v10 = vrot.slane %v840_v48, %v6226_v55  ;;  %v6391_v7 = vrot.slane %v1176_v51, %v6231_v62 }
 0x203   : > { %v6394_v60 = vrot.slane %v1177_v52, %v6231_v62  ;;  %v4991_v61 = vcombine.low %v1168_v49, %v1175_v50  ;;  %v4993_v11 = vcombine.high %v1168_v49, %v1175_v50  ;;  %v2465_v8 = vsel %vm2368_vm1, %v2338_v5, 0 }
 0x204   : > { %v2511_v9 = vsel %vm2368_vm1, %v2339_v58, 0  ;;  %v855_v12 = vrot.slane %v841_v59, %v6226_v55  ;;  %v888_v13 = vcombine.low %v832_v56, %v848_v10  ;;  %5222 = vmatpush3.bf16.xpose.msra.mxu0 %v2465_v8  ;;  %v889_v18 = vcombine.high %v832_v56, %v848_v10 }
 0x205   : > { %5228 = vmatpush3.bf16.xpose.msra.mxu1 %v2511_v9  ;;  %v1634_v19 = vcombine.low %v1583_v57, %v1615_v2  ;;  %v1635_v20 = vcombine.high %v1583_v57, %v1615_v2  ;;  %5233 = vmatprep.subr.bf16.mxu0 %v5882_v1  ;;  %v637_v30 = vpop.permute.xlu0 %636  ;;  %v4995_v31 = vcombine.low %v6391_v7, %v6394_v60  ;;  %v640_v44 = vpop.permute.xlu1 %639 }
 0x206   : > { %v896_v21 = vrot.slane %v888_v13, %v6231_v62  ;;  %v904_v22 = vcombine.low %v839_v0, %v855_v12  ;;  %v905_v29 = vcombine.high %v839_v0, %v855_v12  ;;  %5239 = vmatprep.subr.bf16.mxu1 %v5882_v1  ;;  %v903_v32 = vrot.slane %v889_v18, %v6231_v62 }
 0x207   : > { %v2322_v34 = vpack.c.bf16 %v1634_v19, %v1634_v19  ;;  %v1864_v33 = vrot.slane %v1856_v3, %v6231_v62  ;;  %v2323_v40 = vpack.c.bf16 %v1635_v20, %v1635_v20  ;;  %v1896_v43 = vrot.slane %v1888_v4, %v6231_v62 }
 0x208   : > { %v912_v38 = vrot.slane %v904_v22, %v6231_v62  ;;  %v919_v39 = vrot.slane %v905_v29, %v6231_v62  ;;  %v4975_v36 = vcombine.low %v896_v21, %v903_v32  ;;  %v4977_v37 = vcombine.high %v896_v21, %v903_v32 }
 0x209   : > { %v1128_v45 = vcombine.low %v631_v63, %v637_v30  ;;  %v1129_v48 = vcombine.high %v631_v63, %v637_v30  ;;  %v1908_v51 = vcombine.low %v1864_v33, %v1896_v43  ;;  %v1909_v52 = vcombine.high %v1864_v33, %v1896_v43  ;;  %v585_v3 = vpop.permute.xlu0 %584  ;;  %v588_v18 = vpop.permute.xlu1 %587 }
 0x20a   : > { %v4979_v49 = vcombine.low %v912_v38, %v919_v39  ;;  %v4981_v50 = vcombine.high %v912_v38, %v919_v39  ;;  %v6410_v53 = vrot.slane %v4991_v61, %v6226_v55  ;;  %v6413_v54 = vrot.slane %v4993_v11, %v6226_v55 }
 0x20b   : > { %v4997_v56 = vcombine.high %v6391_v7, %v6394_v60  ;;  %v1144_v57 = vcombine.low %v6388_v6, %v640_v44  ;;  %v6419_v0 = vrot.slane %v4975_v36, %v6226_v55  ;;  %v6422_v63 = vrot.slane %v4977_v37, %v6226_v55  ;;  %5224 = vmatmul.mubr.msk.bf16.vlgmr.msra.gmra.mrb[8].mxu0 %vm2368_vm1, %v2322_v34 }
 0x20c   : > { %5230 = vmatmul.mubr.msk.bf16.vlgmr.msra.gmra.mrb[8].mxu1 %vm2368_vm1, %v2323_v40  ;;  %v2340_v2 = vpack.c.bf16 %v1908_v51, %v1908_v51  ;;  %v2341_v4 = vpack.c.bf16 %v1909_v52, %v1909_v52  ;;  %v1136_v5 = vrot.slane %v1128_v45, %v6226_v55  ;;  %v1143_v58 = vrot.slane %v1129_v48, %v6226_v55 }
 0x20d   : > { %5235 = vmatprep.mubr.msk.bf16.mxu0 %vm5883_vm0, %v5882_v1  ;;  %5241 = vmatprep.mubr.msk.bf16.mxu1 %vm5883_vm0, %v5882_v1  ;;  %v6433_v59 = vrot.slane %v4979_v49, %v6226_v55  ;;  %v6436_v10 = vrot.slane %v4981_v50, %v6226_v55  ;;  %v1145_v60 = vcombine.high %v6388_v6, %v640_v44  ;;  %v591_v32 = vpop.permute.xlu0 %590  ;;  %v594_v49 = vpop.permute.xlu1 %593 }
 0x20e   : > { %v2557_v7 = vsel %vm2368_vm1, %v2340_v2, 0  ;;  %v2603_v61 = vsel %vm2368_vm1, %v2341_v4, 0  ;;  %v1152_v11 = vrot.slane %v1144_v57, %v6226_v55  ;;  %v1592_v8 = vrot.slane %v1584_v35, %v6231_v62 }
 0x20f   : > { %5234 = vmatpush3.bf16.xpose.msra.mxu0 %v2557_v7  ;;  %v1624_v9 = vrot.slane %v1616_v41, %v6231_v62  ;;  %5240 = vmatpush3.bf16.xpose.msra.mxu1 %v2603_v61  ;;  %v1159_v12 = vrot.slane %v1145_v60, %v6226_v55  ;;  %v1857_v6 = vcombine.high %v6316_v47, %v6341_v24 }
 0x210   : > { %5245 = vmatprep.subr.bf16.mxu0 %v5882_v1  ;;  %v1889_v13 = vcombine.high %v6344_v25, %v6347_v26  ;;  %v1192_v19 = vcombine.low %v1136_v5, %v1152_v11  ;;  %v1193_v20 = vcombine.high %v1136_v5, %v1152_v11  ;;  %5251 = vmatprep.subr.bf16.mxu1 %v5882_v1 }
 0x211   : > { %v1636_v35 = vcombine.low %v1592_v8, %v1624_v9  ;;  %v1637_v21 = vcombine.high %v1592_v8, %v1624_v9  ;;  %v1208_v22 = vcombine.low %v1143_v58, %v1159_v12  ;;  %v1209_v41 = vcombine.high %v1143_v58, %v1159_v12 }
 0x212   : > { %v1871_v29 = vrot.slane %v1857_v6, %v6231_v62  ;;  %v1903_v30 = vrot.slane %v1889_v13, %v6231_v62  ;;  %v6460_v34 = vrot.slane %v4995_v31, %v6226_v55  ;;  %v6463_v47 = vrot.slane %v1192_v19, %v6231_v62 }
 0x213   : > { %v6466_v24 = vrot.slane %v1193_v20, %v6231_v62  ;;  %v2324_v25 = vpack.c.bf16 %v1636_v35, %v1636_v35  ;;  %v6469_v26 = vrot.slane %v1208_v22, %v6231_v62  ;;  %v6472_v33 = vrot.slane %v1209_v41, %v6231_v62 }
 0x214   : > { %v1910_v38 = vcombine.low %v1871_v29, %v1903_v30  ;;  %v1911_v39 = vcombine.high %v1871_v29, %v1903_v30  ;;  %v6475_v40 = vrot.slane %v4997_v56, %v6226_v55  ;;  %v2325_v31 = vpack.c.bf16 %v1637_v21, %v1637_v21 }
 0x215   : > { %v856_v43 = vcombine.low %v585_v3, %v591_v32  ;;  %v857_v44 = vcombine.high %v585_v3, %v591_v32  ;;  %v1704_v36 = vcombine.low %v6419_v0, %v6422_v63  ;;  %v1736_v37 = vcombine.low %v6433_v59, %v6436_v10 }
 0x216   : > { %5236 = vmatmul.mubr.msk.bf16.vlgmr.msra.gmra.mrb[12].mxu0 %vm2368_vm1, %v2324_v25  ;;  %v2342_v45 = vpack.c.bf16 %v1910_v38, %v1910_v38  ;;  %v2343_v48 = vpack.c.bf16 %v1911_v39, %v1911_v39  ;;  %v4992_v50 = vcombine.low %v6463_v47, %v6466_v24  ;;  %v4994_v51 = vcombine.high %v6463_v47, %v6466_v24 }
 0x217   : > { %v4996_v52 = vcombine.low %v6469_v26, %v6472_v33  ;;  %v4998_v56 = vcombine.high %v6469_v26, %v6472_v33  ;;  %5242 = vmatmul.mubr.msk.bf16.vlgmr.msra.gmra.mrb[12].mxu1 %vm2368_vm1, %v2325_v31  ;;  %v864_v3 = vrot.slane %v856_v43, %v6226_v55  ;;  %v871_v4 = vrot.slane %v857_v44, %v6226_v55 }
 0x218   : > { %v2649_v57 = vsel %vm2368_vm1, %v2342_v45, 0  ;;  %v2695_v2 = vsel %vm2368_vm1, %v2343_v48, 0  ;;  %5247 = vmatprep.mubr.msk.bf16.mxu0 %vm5883_vm0, %v5882_v1  ;;  %5253 = vmatprep.mubr.msk.bf16.mxu1 %vm5883_vm0, %v5882_v1  ;;  %v872_v5 = vcombine.low %v588_v18, %v594_v49  ;;  %v873_v58 = vcombine.high %v588_v18, %v594_v49 }
 0x219   : > { %5246 = vmatpush3.bf16.xpose.msra.mxu0 %v2649_v57  ;;  %5252 = vmatpush3.bf16.xpose.msra.mxu1 %v2695_v2  ;;  %v1599_v7 = vrot.slane %v1585_v23, %v6231_v62  ;;  %v1631_v60 = vrot.slane %v1617_v42, %v6231_v62  ;;  %v1976_v61 = vcombine.low %v6410_v53, %v6413_v54  ;;  %v644_v57 = vpop.permute.xlu0 %643 }
 0x21a   : > { %5257 = vmatprep.subr.bf16.mxu0 %v5882_v1  ;;  %5263 = vmatprep.subr.bf16.mxu1 %v5882_v1  ;;  %v2008_v11 = vcombine.low %v6460_v34, %v6475_v40  ;;  %v880_v8 = vrot.slane %v872_v5, %v6226_v55  ;;  %v887_v14 = vrot.slane %v873_v58, %v6226_v55 }
 0x21b   : > { %v1712_v15 = vrot.slane %v1704_v36, %v6231_v62  ;;  %v1744_v23 = vrot.slane %v1736_v37, %v6231_v62  ;;  %v1638_v16 = vcombine.low %v1599_v7, %v1631_v60  ;;  %v1639_v17 = vcombine.high %v1599_v7, %v1631_v60 }
 0x21c   : > { %v1984_v42 = vrot.slane %v1976_v61, %v6231_v62  ;;  %v2016_v9 = vrot.slane %v2008_v11, %v6231_v62  ;;  %v920_v12 = vcombine.low %v864_v3, %v880_v8  ;;  %v921_v6 = vcombine.high %v864_v3, %v880_v8 }
 0x21d   : > { %v936_v13 = vcombine.low %v871_v4, %v887_v14  ;;  %v937_v18 = vcombine.high %v871_v4, %v887_v14  ;;  %v2326_v19 = vpack.c.bf16 %v1638_v16, %v1638_v16  ;;  %v2327_v20 = vpack.c.bf16 %v1639_v17, %v1639_v17 }
 0x21e   : > { %v2040_v35 = vcombine.low %v1984_v42, %v2016_v9  ;;  %v2041_v21 = vcombine.high %v1984_v42, %v2016_v9  ;;  %v928_v22 = vrot.slane %v920_v12, %v6231_v62  ;;  %v935_v41 = vrot.slane %v921_v6, %v6231_v62  ;;  %v650_v42 = vpop.permute.xlu0 %649  ;;  %v647_v6 = vpop.permute.xlu1 %646 }
 0x21f   : > { %v944_v29 = vrot.slane %v936_v13, %v6231_v62  ;;  %v951_v30 = vrot.slane %v937_v18, %v6231_v62  ;;  %v1927_v38 = vrot.slane %v4992_v50, %v6226_v55  ;;  %v1943_v39 = vrot.slane %v4994_v51, %v6226_v55 }
 0x220   : > { %5248 = vmatmul.mubr.msk.bf16.vlgmr.msra.gmra.mrb[16].mxu0 %vm2368_vm1, %v2326_v19  ;;  %5254 = vmatmul.mubr.msk.bf16.vlgmr.msra.gmra.mrb[16].mxu1 %vm2368_vm1, %v2327_v20  ;;  %v2344_v32 = vpack.c.bf16 %v2040_v35, %v2040_v35  ;;  %v2345_v47 = vpack.c.bf16 %v2041_v21, %v2041_v21  ;;  %v4976_v24 = vcombine.low %v928_v22, %v935_v41 }
 0x221   : > { %v4978_v25 = vcombine.high %v928_v22, %v935_v41  ;;  %v4980_v26 = vcombine.low %v944_v29, %v951_v30  ;;  %v4982_v33 = vcombine.high %v944_v29, %v951_v30  ;;  %5259 = vmatprep.mubr.msk.bf16.mxu0 %vm5883_vm0, %v5882_v1  ;;  %5265 = vmatprep.mubr.msk.bf16.mxu1 %vm5883_vm0, %v5882_v1 }
 0x222   : > { %v2741_v31 = vsel %vm2368_vm1, %v2344_v32, 0  ;;  %v1959_v43 = vrot.slane %v4996_v52, %v6226_v55  ;;  %v1975_v44 = vrot.slane %v4998_v56, %v6226_v55  ;;  %v2787_v36 = vsel %vm2368_vm1, %v2345_v47, 0 }
 0x223   : > { %5258 = vmatpush3.bf16.xpose.msra.mxu0 %v2741_v31  ;;  %v1768_v37 = vcombine.low %v1712_v15, %v1744_v23  ;;  %5264 = vmatpush3.bf16.xpose.msra.mxu1 %v2787_v36  ;;  %v1769_v45 = vcombine.high %v1712_v15, %v1744_v23  ;;  %v1977_v48 = vcombine.high %v6410_v53, %v6413_v54 }
 0x224   : > { %5269 = vmatprep.subr.bf16.mxu0 %v5882_v1  ;;  %v2009_v49 = vcombine.high %v6460_v34, %v6475_v40  ;;  %v6541_v50 = vrot.slane %v4976_v24, %v6226_v55  ;;  %v6544_v51 = vrot.slane %v4978_v25, %v6226_v55  ;;  %v6547_v52 = vrot.slane %v4980_v26, %v6226_v55 }
 0x225   : > { %v6550_v56 = vrot.slane %v4982_v33, %v6226_v55  ;;  %5275 = vmatprep.subr.bf16.mxu1 %v5882_v1  ;;  %v1705_v53 = vcombine.high %v6419_v0, %v6422_v63  ;;  %v1737_v54 = vcombine.high %v6433_v59, %v6436_v10  ;;  %v1991_v34 = vrot.slane %v1977_v48, %v6231_v62 }
 0x226   : > { %v2023_v40 = vrot.slane %v2009_v49, %v6231_v62  ;;  %v1992_v2 = vcombine.low %v1927_v38, %v1943_v39  ;;  %v2024_v3 = vcombine.low %v1959_v43, %v1975_v44  ;;  %v2328_v4 = vpack.c.bf16 %v1768_v37, %v1768_v37 }
 0x227   : > { %v2329_v5 = vpack.c.bf16 %v1769_v45, %v1769_v45  ;;  %v1720_v60 = vcombine.low %v6541_v50, %v6544_v51  ;;  %v1752_v0 = vcombine.low %v6547_v52, %v6550_v56  ;;  %v1719_v11 = vrot.slane %v1705_v53, %v6231_v62 }
 0x228   : > { %v2042_v58 = vcombine.low %v1991_v34, %v2023_v40  ;;  %v2043_v7 = vcombine.high %v1991_v34, %v2023_v40  ;;  %v2000_v63 = vrot.slane %v1992_v2, %v6231_v62  ;;  %v2032_v59 = vrot.slane %v2024_v3, %v6231_v62 }
 0x229   : > { %v1751_v8 = vrot.slane %v1737_v54, %v6231_v62  ;;  %v1993_v17 = vcombine.high %v1927_v38, %v1943_v39  ;;  %v1728_v9 = vrot.slane %v1720_v60, %v6231_v62  ;;  %v2025_v12 = vcombine.high %v1959_v43, %v1975_v44 }
 0x22a   : > { %5260 = vmatmul.mubr.msk.bf16.vlgmr.msra.gmra.mrb[20].mxu0 %vm2368_vm1, %v2328_v4  ;;  %v2346_v10 = vpack.c.bf16 %v2042_v58, %v2042_v58  ;;  %v2347_v61 = vpack.c.bf16 %v2043_v7, %v2043_v7  ;;  %5266 = vmatmul.mubr.msk.bf16.vlgmr.msra.gmra.mrb[20].mxu1 %vm2368_vm1, %v2329_v5  ;;  %v2044_v14 = vcombine.low %v2000_v63, %v2032_v59 }
 0x22b   : > { %5271 = vmatprep.mubr.msk.bf16.mxu0 %vm5883_vm0, %v5882_v1  ;;  %5277 = vmatprep.mubr.msk.bf16.mxu1 %vm5883_vm0, %v5882_v1  ;;  %v2045_v16 = vcombine.high %v2000_v63, %v2032_v59  ;;  %v1770_v13 = vcombine.low %v1719_v11, %v1751_v8  ;;  %v1771_v18 = vcombine.high %v1719_v11, %v1751_v8 }
 0x22c   : > { %v2833_v15 = vsel %vm2368_vm1, %v2346_v10, 0  ;;  %v2879_v23 = vsel %vm2368_vm1, %v2347_v61, 0  ;;  %v1760_v19 = vrot.slane %v1752_v0, %v6231_v62  ;;  %v2348_v20 = vpack.c.bf16 %v2044_v14, %v2044_v14 }
 0x22d   : > { %5270 = vmatpush3.bf16.xpose.msra.mxu0 %v2833_v15  ;;  %5276 = vmatpush3.bf16.xpose.msra.mxu1 %v2879_v23  ;;  %v2007_v35 = vrot.slane %v1993_v17, %v6231_v62  ;;  %v2039_v21 = vrot.slane %v2025_v12, %v6231_v62  ;;  %v1248_v22 = vcombine.low %v644_v57, %v650_v42 }
 0x22e   : > { %5281 = vmatprep.subr.bf16.mxu0 %v5882_v1  ;;  %5287 = vmatprep.subr.bf16.mxu1 %v5882_v1  ;;  %v2349_v41 = vpack.c.bf16 %v2045_v16, %v2045_v16  ;;  %v1249_v29 = vcombine.high %v644_v57, %v650_v42  ;;  %v1232_v30 = vcombine.low %v6197_v46, %v647_v6  ;;  %v2925_v39 = vsel %vm2368_vm1, %v2348_v20, 0 }
 0x22f   : > { %v1721_v32 = vcombine.high %v6541_v50, %v6544_v51  ;;  %v1256_v47 = vrot.slane %v1248_v22, %v6226_v55  ;;  %v1233_v24 = vcombine.high %v6197_v46, %v647_v6  ;;  %v2330_v25 = vpack.c.bf16 %v1770_v13, %v1770_v13 }
 0x230   : > { %v2331_v26 = vpack.c.bf16 %v1771_v18, %v1771_v18  ;;  %v1263_v33 = vrot.slane %v1249_v29, %v6226_v55  ;;  %v1240_v38 = vrot.slane %v1232_v30, %v6226_v55  ;;  %v1772_v31 = vcombine.low %v1728_v9, %v1760_v19 }
 0x231   : > { %v2046_v43 = vcombine.low %v2007_v35, %v2039_v21  ;;  %v1247_v44 = vrot.slane %v1233_v24, %v6226_v55  ;;  %v2971_v36 = vsel %vm2368_vm1, %v2349_v41, 0  ;;  %v2047_v37 = vcombine.high %v2007_v35, %v2039_v21 }
 0x232   : > { %v1296_v46 = vcombine.low %v1240_v38, %v1256_v47  ;;  %v1297_v45 = vcombine.high %v1240_v38, %v1256_v47  ;;  %v1773_v48 = vcombine.high %v1728_v9, %v1760_v19  ;;  %v1753_v51 = vcombine.high %v6547_v52, %v6550_v56  ;;  %v656_v47 = vpop.permute.xlu0 %655 }
 0x233   : > { %v1312_v49 = vcombine.low %v1247_v44, %v1263_v33  ;;  %v1313_v50 = vcombine.high %v1247_v44, %v1263_v33  ;;  %v2350_v57 = vpack.c.bf16 %v2046_v43, %v2046_v43  ;;  %v2351_v52 = vpack.c.bf16 %v2047_v37, %v2047_v37 }
 0x234   : > { %5272 = vmatmul.mubr.msk.bf16.vlgmr.msra.gmra.mrb[24].mxu0 %vm2368_vm1, %v2330_v25  ;;  %5278 = vmatmul.mubr.msk.bf16.vlgmr.msra.gmra.mrb[24].mxu1 %vm2368_vm1, %v2331_v26  ;;  %v1304_v53 = vrot.slane %v1296_v46, %v6231_v62  ;;  %v1311_v54 = vrot.slane %v1297_v45, %v6231_v62  ;;  %v2332_v3 = vpack.c.bf16 %v1772_v31, %v1772_v31 }
 0x235   : > { %5282 = vmatpush3.bf16.xpose.msra.mxu0 %v2925_v39  ;;  %5288 = vmatpush3.bf16.xpose.msra.mxu1 %v2971_v36  ;;  %v1320_v34 = vrot.slane %v1312_v49, %v6231_v62  ;;  %v1327_v40 = vrot.slane %v1313_v50, %v6231_v62  ;;  %v2333_v4 = vpack.c.bf16 %v1773_v48, %v1773_v48  ;;  %v3017_v61 = vsel %vm2368_vm1, %v2350_v57, 0 }
 0x236   : > { %5283 = vmatprep.mubr.msk.bf16.mxu0 %vm5883_vm0, %v5882_v1  ;;  %5289 = vmatprep.mubr.msk.bf16.mxu1 %vm5883_vm0, %v5882_v1  ;;  %v4999_v56 = vcombine.low %v1304_v53, %v1311_v54  ;;  %v5001_v2 = vcombine.high %v1304_v53, %v1311_v54  ;;  %v1735_v7 = vrot.slane %v1721_v32, %v6231_v62  ;;  %v3063_v11 = vsel %vm2368_vm1, %v2351_v52, 0  ;;  %v653_v32 = vpop.permute.xlu1 %652  ;;  %v662_v25 = vpop.permute.xlu0 %661 }
 0x237   : > { %5293 = vmatprep.subr.bf16.mxu0 %v5882_v1  ;;  %5299 = vmatprep.subr.bf16.mxu1 %v5882_v1  ;;  %v5003_v5 = vcombine.low %v1320_v34, %v1327_v40  ;;  %v5005_v58 = vcombine.high %v1320_v34, %v1327_v40  ;;  %v1767_v60 = vrot.slane %v1753_v51, %v6231_v62 }
 0x238   : > { %v2056_v0 = vrot.slane %v4999_v56, %v6226_v55  ;;  %v2072_v63 = vrot.slane %v5001_v2, %v6226_v55  ;;  %v1280_v46 = vcombine.low %v656_v47, %v662_v25  ;;  %v1281_v49 = vcombine.high %v656_v47, %v662_v25  ;;  %v534_v25 = vld [vmem:[#allocation7] sm:$0xf] }
 0x239   : > { %v2088_v59 = vrot.slane %v5003_v5, %v6226_v55  ;;  %v2104_v10 = vrot.slane %v5005_v58, %v6226_v55  ;;  %v1774_v15 = vcombine.low %v1735_v7, %v1767_v60  ;;  %v1775_v23 = vcombine.high %v1735_v7, %v1767_v60 }
 0x23a   : > { %v2112_v8 = vcombine.low %v2056_v0, %v2072_v63  ;;  %v2113_v35 = vcombine.high %v2056_v0, %v2072_v63  ;;  %v659_v24 = vpop.permute.xlu1 %658  ;;  %v1288_v51 = vrot.slane %v1280_v46, %v6226_v55  ;;  %v1295_v34 = vrot.slane %v1281_v49, %v6226_v55  ;;  %v668_v57 = vpop.permute.xlu0 %667 }
 0x23b   : > { %v2144_v14 = vcombine.low %v2088_v59, %v2104_v10  ;;  %v2334_v12 = vpack.c.bf16 %v1774_v15, %v1774_v15  ;;  %v2335_v6 = vpack.c.bf16 %v1775_v23, %v1775_v23  ;;  %v2145_v22 = vcombine.high %v2088_v59, %v2104_v10 }
 0x23c   : > { %5284 = vmatmul.mubr.msk.bf16.vlgmr.msra.gmra.mrb[28].mxu0 %vm2368_vm1, %v2332_v3  ;;  %5290 = vmatmul.mubr.msk.bf16.vlgmr.msra.gmra.mrb[28].mxu1 %vm2368_vm1, %v2333_v4  ;;  %v2120_v16 = vrot.slane %v2112_v8, %v6231_v62  ;;  %v2127_v21 = vrot.slane %v2113_v35, %v6231_v62  ;;  %v1264_v45 = vcombine.low %v653_v32, %v659_v24 }
 0x23d   : > { %5294 = vmatpush3.bf16.xpose.msra.mxu0 %v3017_v61  ;;  %5300 = vmatpush3.bf16.xpose.msra.mxu1 %v3063_v11  ;;  %v2152_v17 = vrot.slane %v2144_v14, %v6231_v62  ;;  %v2159_v41 = vrot.slane %v2145_v22, %v6231_v62  ;;  %v1265_v50 = vcombine.high %v653_v32, %v659_v24 }
 0x23e   : > { %5295 = vmatprep.mubr.msk.bf16.mxu0 %vm5883_vm0, %v5882_v1  ;;  %5301 = vmatprep.mubr.msk.bf16.mxu1 %vm5883_vm0, %v5882_v1  ;;  %v1272_v53 = vrot.slane %v1264_v45, %v6226_v55  ;;  %v6641_v54 = vpop.permute.xlu1 %664 }
 0x23f   : > { %5305 = vmatprep.subr.bf16.mxu0 %v5882_v1  ;;  %5311 = vmatprep.subr.bf16.mxu1 %v5882_v1  ;;  %v2176_v42 = vcombine.low %v2120_v16, %v2152_v17  ;;  %v2177_v9 = vcombine.high %v2120_v16, %v2152_v17  ;;  %v6635_v29 = vcombine.low %v2127_v21, %v2159_v41 }
 0x240   : > { %v6637_v30 = vcombine.high %v2127_v21, %v2159_v41  ;;  %v1279_v40 = vrot.slane %v1265_v50, %v6226_v55  ;;  %v1328_v52 = vcombine.low %v1272_v53, %v1288_v51  ;;  %v1329_v56 = vcombine.high %v1272_v53, %v1288_v51 }
 0x241   : > { %v2352_v13 = vpack.c.bf16 %v2176_v42, %v2176_v42  ;;  %v2353_v18 = vpack.c.bf16 %v2177_v9, %v2177_v9  ;;  %v674_v9 = vpop.permute.xlu0 %673  ;;  %v2354_v51 = vpack.c.bf16 %v6635_v29, %v6635_v29 }
 0x242   : > { %v1344_v3 = vcombine.low %v1279_v40, %v1295_v34  ;;  %v1345_v4 = vcombine.high %v1279_v40, %v1295_v34  ;;  %v671_v60 = vpop.permute.xlu1 %670  ;;  %v1336_v14 = vrot.slane %v1328_v52, %v6231_v62  ;;  %v1343_v15 = vrot.slane %v1329_v56, %v6231_v62 }
 0x243   : > { %v3288_v19 = vsel %vm3286_vm2, %v2352_v13, 0  ;;  %v3334_v20 = vsel %vm3286_vm2, %v2353_v18, 0  ;;  %v1384_v35 = vcombine.low %v668_v57, %v674_v9  ;;  %v1385_v21 = vcombine.high %v668_v57, %v674_v9 }
 0x244   : > { %5296 = vmatmul.mubr.msk.bf16.vlgmr.msra.gmra.mrb[32].mxu0 %vm2368_vm1, %v2334_v12  ;;  %5302 = vmatmul.mubr.msk.bf16.vlgmr.msra.gmra.mrb[32].mxu1 %vm2368_vm1, %v2335_v6  ;;  %v1352_v17 = vrot.slane %v1344_v3, %v6231_v62  ;;  %v1359_v42 = vrot.slane %v1345_v4, %v6231_v62  ;;  %v532_v6 = vand.u32 127, %v305_v27  ;;  %v5000_v13 = vcombine.low %v1336_v14, %v1343_v15 }
 0x245   : > { %5307 = vmatprep.mubr.msk.bf16.mxu0 %vm5883_vm0, %v5882_v1  ;;  %5313 = vmatprep.mubr.msk.bf16.mxu1 %vm5883_vm0, %v5882_v1  ;;  %v5002_v18 = vcombine.high %v1336_v14, %v1343_v15  ;;  %v1368_v22 = vcombine.low %v6641_v54, %v671_v60  ;;  %v1369_v32 = vcombine.high %v6641_v54, %v671_v60  ;;  %v6654_v47 = vpop.permute.xlu0 %679 }
 0x246   : > { %5306 = vmatpush3.bf16.msra.mxu0 %v3288_v19  ;;  %5312 = vmatpush3.bf16.msra.mxu1 %v3334_v20  ;;  %v5004_v19 = vcombine.low %v1352_v17, %v1359_v42  ;;  %v5006_v20 = vcombine.high %v1352_v17, %v1359_v42  ;;  %v6651_v41 = vpop.permute.xlu1 %676  ;;  %vm6657_vm3 = vcmp.le.s32.totalorder %v532_v6, %v6133_v28 }
 0x247   : > { %5317 = vmatprep.subr.bf16.mxu0 %v5882_v1  ;;  %5323 = vmatprep.subr.bf16.mxu1 %v5882_v1  ;;  %v6662_v27 = vrot.slane %v5000_v13, %v6226_v55  ;;  %v1392_v28 = vrot.slane %v1384_v35, %v6226_v55  ;;  %v1399_v45 = vrot.slane %v1385_v21, %v6226_v55 }
 0x248   : > { %v1383_v54 = vrot.slane %v1369_v32, %v6226_v55  ;;  %v2355_v57 = vpack.c.bf16 %v6637_v30, %v6637_v30 }
 0x24a   : > { %v6697_v14 = vpop.permute.xlu1 %682 }
 0x2d2   : > { %v2409_v26 = vpop.f32.mrb[4].mxu0 }
 0x2d3   : > { %v5031_v33 = vmul.f32 -1.442695, %v2409_v26  ;;  %v2455_v38 = vpop.f32.mrb[4].mxu1  ;;  %v5213_v39 = vpop.f32.mrb[5].mxu0  ;;  %v6665_v26 = vrot.slane %v5002_v18, %v6226_v55 }
 0x2d4   : > { %v5032_v31 = vmul.f32 -1.442695, %v2455_v38  ;;  %v5219_v43 = vpop.f32.mrb[5].mxu1  ;;  %v2412_v44 = vpop.f32.mrb[6].mxu0 }
 0x2d5   : > { %5620 = vpow2.f32 %v5031_v33  ;;  %v2458_v36 = vpop.f32.mrb[6].mxu1  ;;  %v5214_v37 = vpop.f32.mrb[7].mxu0  ;;  %v6671_v43 = vrot.slane %v5006_v20, %v6226_v55  ;;  %v2128_v29 = vcombine.low %v6662_v27, %v6665_v26 }
 0x2d6   : > { %5622 = vpow2.f32 %v5032_v31  ;;  %v5220_v48 = vpop.f32.mrb[7].mxu1  ;;  %v6668_v31 = vrot.slane %v5004_v19, %v6226_v55 }
 0x2d7   : > { %v1376_v48 = vrot.slane %v1368_v22, %v6226_v55 }
 0x2d8   : > { %v2160_v60 = vcombine.low %v6668_v31, %v6671_v43 }
 0x2d9   : > { %v1432_v30 = vcombine.low %v1376_v48, %v1392_v28 }
 0x2da   : > { %v2168_v17 = vrot.slane %v2160_v60, %v6231_v62 }
 0x2db   : > { %v1440_v42 = vrot.slane %v1432_v30, %v6231_v62 }
 0x2de   : > { %v2501_v5 = vpop.f32.mrb[8].mxu0 }
 0x2df   : > { %v5621_v2 = vpop.eup %5620  ;;  %v2547_v58 = vpop.f32.mrb[8].mxu1  ;;  %v5033_v63 = vmul.f32 -1.442695, %v2501_v5 }
 0x2e0   : > { %v5623_v7 = vpop.eup %5622  ;;  %v3153_v0 = vadd.f32 1.0, %v5621_v2  ;;  %v5225_v59 = vpop.f32.mrb[9].mxu0  ;;  %v5034_v61 = vmul.f32 -1.442695, %v2547_v58 }
 0x2e1   : > { %v3154_v10 = vadd.f32 1.0, %v5623_v7  ;;  %v5231_v11 = vpop.f32.mrb[9].mxu1  ;;  %v2504_v8 = vpop.f32.mrb[10].mxu0  ;;  %v3380_v59 = vsel %vm3286_vm2, %v2354_v51, 0 }
 0x2e2   : > { %5624 = vrcp.f32 %v3153_v0  ;;  %v2550_v23 = vpop.f32.mrb[10].mxu1  ;;  %v5226_v16 = vpop.f32.mrb[11].mxu0  ;;  %v1433_v0 = vcombine.high %v1376_v48, %v1392_v28  ;;  %v3426_v11 = vsel %vm3286_vm2, %v2355_v57, 0 }
 0x2e3   : > { %5626 = vrcp.f32 %v3154_v10  ;;  %v5232_v12 = vpop.f32.mrb[11].mxu1  ;;  %v1448_v10 = vcombine.low %v1383_v54, %v1399_v45  ;;  %v6695_v8 = vpop.permute.xlu0 %685  ;;  %v2136_v16 = vrot.slane %v2128_v29, %v6231_v62 }
 0x2e4   : > { %5628 = vpow2.f32 %v5033_v63  ;;  %v1447_v9 = vrot.slane %v1433_v0, %v6231_v62  ;;  %v1416_v32 = vcombine.low %v6654_v47, %v6695_v8  ;;  %v1417_v51 = vcombine.high %v6654_v47, %v6695_v8 }
 0x2e5   : > { %5630 = vpow2.f32 %v5034_v61  ;;  %v1449_v61 = vcombine.high %v1383_v54, %v1399_v45  ;;  %v1456_v19 = vrot.slane %v1448_v10, %v6231_v62 }
 0x2e6   : > { %v5009_v45 = vcombine.high %v1440_v42, %v1447_v9  ;;  %v6722_v54 = vrot.slane %v1416_v32, %v6226_v55 }
 0x2e7   : > { %v1463_v20 = vrot.slane %v1449_v61, %v6231_v62 }
 0x2e9   : > { %v2593_v24 = vpop.f32.mrb[12].mxu0 }
 0x2ea   : > { %v5035_v33 = vmul.f32 -1.442695, %v2593_v24  ;;  %v2639_v38 = vpop.f32.mrb[12].mxu1  ;;  %v5237_v39 = vpop.f32.mrb[13].mxu0  ;;  %v1400_v24 = vcombine.low %v6651_v41, %v6697_v14 }
 0x2eb   : > { %v5036_v44 = vmul.f32 -1.442695, %v2639_v38  ;;  %v5243_v36 = vpop.f32.mrb[13].mxu1  ;;  %v2596_v37 = vpop.f32.mrb[14].mxu0  ;;  %v2129_v39 = vcombine.high %v6662_v27, %v6665_v26  ;;  %v1401_v27 = vcombine.high %v6651_v41, %v6697_v14 }
 0x2ec   : > { %v5625_v46 = vpop.eup %5624  ;;  %5632 = vpow2.f32 %v5035_v33  ;;  %v2642_v49 = vpop.f32.mrb[14].mxu1  ;;  %v2180_v36 = vcombine.low %v2136_v16, %v2168_v17  ;;  %v2161_v37 = vcombine.high %v6668_v31, %v6671_v43  ;;  %v6727_v31 = vrot.slane %v1400_v24, %v6226_v55 }
 0x2ed   : > { %v5238_v50 = vpop.f32.mrb[15].mxu0  ;;  %v5627_v53 = vpop.eup %5626  ;;  %5634 = vpow2.f32 %v5036_v44  ;;  %v3203_v40 = vsel %vm6657_vm3, %v5625_v46, 0.0  ;;  %v5007_v46 = vcombine.low %v1440_v42, %v1447_v9  ;;  %v2181_v49 = vcombine.high %v2136_v16, %v2168_v17 }
 0x2ee   : > { %v5244_v34 = vpop.f32.mrb[15].mxu1  ;;  %v5629_v52 = vpop.eup %5628  ;;  %v3204_v56 = vsel %vm6657_vm3, %v5627_v53, 0.0  ;;  %v3219_v2 = vsel %vm2368_vm1, %v3203_v40, 0.0  ;;  %v3267_v3 = vpack.c.bf16 %v3203_v40, %v3203_v40  ;;  %v5011_v50 = vcombine.low %v1456_v19, %v1463_v20 }
 0x2ef   : > { %v5631_v4 = vpop.eup %5630  ;;  %v3155_v5 = vadd.f32 1.0, %v5629_v52  ;;  %v3222_v58 = vsel %vm2368_vm1, %v3204_v56, 0.0  ;;  %v3268_v7 = vpack.c.bf16 %v3204_v56, %v3204_v56  ;;  %3220 = vadd.xlane.f32.xlu1 %v3219_v2  ;;  %v5013_v53 = vcombine.high %v1456_v19, %v1463_v20 }
 0x2f0   : > { %v3156_v63 = vadd.f32 1.0, %v5631_v4  ;;  %3223 = vadd.xlane.f32.xlu0 %v3222_v58  ;;  %5308 = vmatmul.mubr.msk.bf16.vlgmr.msra.gmra.mrb[36].mxu0 %vm2368_vm1, %v3267_v3  ;;  %v2356_v43 = vpack.c.bf16 %v2180_v36, %v2180_v36  ;;  %v2143_v34 = vrot.slane %v2129_v39, %v6231_v62  ;;  %v2175_v40 = vrot.slane %v2161_v37, %v6231_v62 }
 0x2f1   : > { %5636 = vrcp.f32 %v3155_v5  ;;  %5314 = vmatmul.mubr.msk.bf16.vlgmr.msra.gmra.mrb[36].mxu1 %vm2368_vm1, %v3268_v7  ;;  %5318 = vmatpush3.bf16.msra.mxu0 %v3380_v59  ;;  %v6732_v47 = vrot.slane %v5007_v46, %v6226_v55  ;;  %v6735_v52 = vrot.slane %v5009_v45, %v6226_v55  ;;  %v2357_v56 = vpack.c.bf16 %v2181_v49, %v2181_v49 }
 0x2f2   : > { %5638 = vrcp.f32 %v3156_v63  ;;  %5324 = vmatpush3.bf16.msra.mxu1 %v3426_v11  ;;  %5319 = vmatprep.mubr.msk.bf16.mxu0 %vm5883_vm0, %v5882_v1  ;;  %v6740_v2 = vrot.slane %v5011_v50, %v6226_v55  ;;  %v6746_v58 = vrot.slane %v5013_v53, %v6226_v55  ;;  %v3472_v11 = vsel %vm3286_vm2, %v2356_v43, 0 }
 0x2f3   : > { %v2685_v15 = vpop.f32.mrb[16].mxu0  ;;  %v2731_v23 = vpop.f32.mrb[16].mxu1  ;;  %5325 = vmatprep.mubr.msk.bf16.mxu1 %vm5883_vm0, %v5882_v1  ;;  %5329 = vmatprep.subr.bf16.mxu0 %v5882_v1  ;;  %v2182_v8 = vcombine.low %v2143_v34, %v2175_v40  ;;  %v2183_v14 = vcombine.high %v2143_v34, %v2175_v40  ;;  %v1415_v16 = vrot.slane %v1401_v27, %v6226_v55  ;;  %v3518_v9 = vsel %vm3286_vm2, %v2357_v56, 0 }
 0x2f4   : > { %v5037_v12 = vmul.f32 -1.442695, %v2685_v15  ;;  %v5038_v6 = vmul.f32 -1.442695, %v2731_v23  ;;  %v5249_v13 = vpop.f32.mrb[17].mxu0  ;;  %v5255_v18 = vpop.f32.mrb[17].mxu1  ;;  %5335 = vmatprep.subr.bf16.mxu1 %v5882_v1  ;;  %v1431_v23 = vrot.slane %v1417_v51, %v6226_v55  ;;  %v2248_v19 = vcombine.low %v6732_v47, %v6735_v52 }
 0x2f5   : > { %v2688_v35 = vpop.f32.mrb[18].mxu0  ;;  %v2734_v21 = vpop.f32.mrb[18].mxu1  ;;  %v2280_v20 = vcombine.low %v6740_v2, %v6746_v58  ;;  %v2359_v32 = vpack.c.bf16 %v2183_v14, %v2183_v14 }
 0x2f6   : > { %v5633_v22 = vpop.eup %5632  ;;  %5640 = vpow2.f32 %v5037_v12  ;;  %v5250_v33 = vpop.f32.mrb[19].mxu0  ;;  %v1464_v21 = vcombine.low %v6727_v31, %v6722_v54 }
 0x2f7   : > { %v5256_v38 = vpop.f32.mrb[19].mxu1  ;;  %v5635_v28 = vpop.eup %5634  ;;  %v3157_v44 = vadd.f32 1.0, %v5633_v22  ;;  %5642 = vpow2.f32 %v5038_v6  ;;  %v2358_v22 = vpack.c.bf16 %v2182_v8, %v2182_v8  ;;  %v1465_v33 = vcombine.high %v6727_v31, %v6722_v54 }
 0x2f8   : > { %v3158_v48 = vadd.f32 1.0, %v5635_v28  ;;  %v1480_v38 = vcombine.low %v1415_v16, %v1431_v23  ;;  %v1481_v28 = vcombine.high %v1415_v16, %v1431_v23  ;;  %v2288_v49 = vrot.slane %v2280_v20, %v6231_v62 }
 0x2f9   : > { %5644 = vrcp.f32 %v3157_v44  ;;  %v3564_v53 = vsel %vm3286_vm2, %v2358_v22, 0  ;;  %v3610_v54 = vsel %vm3286_vm2, %v2359_v32, 0  ;;  %v1472_v27 = vrot.slane %v1464_v21, %v6231_v62 }
 0x2fa   : > { %5646 = vrcp.f32 %v3158_v48  ;;  %v2256_v48 = vrot.slane %v2248_v19, %v6231_v62 }
 0x2fb   : > { %v5637_v26 = vpop.eup %5636 }
 0x2fc   : > { %v5639_v57 = vpop.eup %5638  ;;  %v3205_v41 = vsel %vm6657_vm3, %v5637_v26, 0.0  ;;  %v1479_v26 = vrot.slane %v1465_v33, %v6231_v62 }
 0x2fd   : > { %v2777_v3 = vpop.f32.mrb[20].mxu0  ;;  %v3206_v29 = vsel %vm6657_vm3, %v5639_v57, 0.0  ;;  %v3225_v4 = vsel %vm2368_vm1, %v3205_v41, 0.0  ;;  %v3269_v5 = vpack.c.bf16 %v3205_v41, %v3205_v41  ;;  %v2823_v60 = vpop.f32.mrb[20].mxu1  ;;  %v1488_v57 = vrot.slane %v1480_v38, %v6231_v62 }
 0x2fe   : > { %v5039_v7 = vmul.f32 -1.442695, %v2777_v3  ;;  %v5261_v30 = vpop.f32.mrb[21].mxu0  ;;  %v3228_v0 = vsel %vm2368_vm1, %v3206_v29, 0.0  ;;  %v3270_v63 = vpack.c.bf16 %v3206_v29, %v3206_v29  ;;  %3226 = vadd.xlane.f32.xlu0 %v3225_v4  ;;  %v5040_v59 = vmul.f32 -1.442695, %v2823_v60 }
 0x2ff   : > { %v5267_v10 = vpop.f32.mrb[21].mxu1  ;;  %v2780_v61 = vpop.f32.mrb[22].mxu0  ;;  %3229 = vadd.xlane.f32.xlu1 %v3228_v0  ;;  %5320 = vmatmul.mubr.msk.bf16.vlgmr.msra.gmra.mrb[40].mxu0 %vm2368_vm1, %v3269_v5  ;;  %v1495_v41 = vrot.slane %v1481_v28, %v6231_v62  ;;  %v2249_v29 = vcombine.high %v6732_v47, %v6735_v52  ;;  %v2312_v60 = vcombine.low %v2256_v48, %v2288_v49 }
 0x300   : > { %v5641_v15 = vpop.eup %5640  ;;  %5648 = vpow2.f32 %v5039_v7  ;;  %v2826_v17 = vpop.f32.mrb[22].mxu1  ;;  %5326 = vmatmul.mubr.msk.bf16.vlgmr.msra.gmra.mrb[40].mxu1 %vm2368_vm1, %v3270_v63  ;;  %5330 = vmatpush3.bf16.msra.mxu0 %v3472_v11  ;;  %v2313_v30 = vcombine.high %v2256_v48, %v2288_v49  ;;  %v5008_v47 = vcombine.low %v1472_v27, %v1479_v26  ;;  %v5010_v52 = vcombine.high %v1472_v27, %v1479_v26 }
 0x301   : > { %v5262_v42 = vpop.f32.mrb[23].mxu0  ;;  %v5643_v12 = vpop.eup %5642  ;;  %v3159_v6 = vadd.f32 1.0, %v5641_v15  ;;  %5650 = vpow2.f32 %v5040_v59  ;;  %5336 = vmatpush3.bf16.msra.mxu1 %v3518_v9  ;;  %5331 = vmatprep.mubr.msk.bf16.mxu0 %vm5883_vm0, %v5882_v1  ;;  %v2281_v59 = vcombine.high %v6740_v2, %v6746_v58  ;;  %v5012_v11 = vcombine.low %v1488_v57, %v1495_v41 }
 0x302   : > { %v5268_v13 = vpop.f32.mrb[23].mxu1  ;;  %v3160_v18 = vadd.f32 1.0, %v5643_v12  ;;  %5337 = vmatprep.mubr.msk.bf16.mxu1 %vm5883_vm0, %v5882_v1  ;;  %5341 = vmatprep.subr.bf16.mxu0 %v5882_v1  ;;  %v5014_v8 = vcombine.high %v1488_v57, %v1495_v41  ;;  %v2263_v14 = vrot.slane %v2249_v29, %v6231_v62  ;;  %v2360_v16 = vpack.c.bf16 %v2312_v60, %v2312_v60 }
 0x303   : > { %v5645_v35 = vpop.eup %5644  ;;  %5652 = vrcp.f32 %v3159_v6  ;;  %5347 = vmatprep.subr.bf16.mxu1 %v5882_v1  ;;  %v2361_v17 = vpack.c.bf16 %v2313_v30, %v2313_v30  ;;  %v2295_v6 = vrot.slane %v2281_v59, %v6231_v62  ;;  %v6803_v13 = vrot.slane %v5008_v47, %v6226_v55 }
 0x304   : > { %v5647_v24 = vpop.eup %5646  ;;  %5654 = vrcp.f32 %v3160_v18  ;;  %v3207_v39 = vsel %vm6657_vm3, %v5645_v35, 0.0  ;;  %v6806_v22 = vrot.slane %v5010_v52, %v6226_v55  ;;  %v6809_v32 = vrot.slane %v5012_v11, %v6226_v55 }
 0x305   : > { %v3208_v44 = vsel %vm6657_vm3, %v5647_v24, 0.0  ;;  %v3231_v36 = vsel %vm2368_vm1, %v3207_v39, 0.0  ;;  %v3271_v37 = vpack.c.bf16 %v3207_v39, %v3207_v39  ;;  %v6812_v24 = vrot.slane %v5014_v8, %v6226_v55 }
 0x306   : > { %v3234_v46 = vsel %vm2368_vm1, %v3208_v44, 0.0  ;;  %v3272_v45 = vpack.c.bf16 %v3208_v44, %v3208_v44  ;;  %3232 = vadd.xlane.f32.xlu0 %v3231_v36  ;;  %v3656_v36 = vsel %vm3286_vm2, %v2360_v16, 0  ;;  %v2314_v55 = vcombine.low %v2263_v14, %v2295_v6 }
 0x307   : > { %v2869_v50 = vpop.f32.mrb[24].mxu0  ;;  %v2915_v51 = vpop.f32.mrb[24].mxu1  ;;  %3235 = vadd.xlane.f32.xlu1 %v3234_v46  ;;  %5332 = vmatmul.mubr.msk.bf16.vlgmr.msra.gmra.mrb[44].mxu0 %vm2368_vm1, %v3271_v37  ;;  %v3702_v37 = vsel %vm3286_vm2, %v2361_v17, 0  ;;  %v2297_v16 = vcombine.high %v6809_v32, %v6812_v24 }
 0x308   : > { %v5041_v31 = vmul.f32 -1.442695, %v2869_v50  ;;  %v5042_v43 = vmul.f32 -1.442695, %v2915_v51  ;;  %v5273_v34 = vpop.f32.mrb[25].mxu0  ;;  %v5279_v40 = vpop.f32.mrb[25].mxu1  ;;  %5338 = vmatmul.mubr.msk.bf16.vlgmr.msra.gmra.mrb[44].mxu1 %vm2368_vm1, %v3272_v45  ;;  %5342 = vmatpush3.bf16.msra.mxu0 %v3564_v53  ;;  %v2315_v45 = vcombine.high %v2263_v14, %v2295_v6  ;;  %v2264_v50 = vcombine.low %v6803_v13, %v6806_v22 }
 0x309   : > { %v2872_v56 = vpop.f32.mrb[26].mxu0  ;;  %v2918_v3 = vpop.f32.mrb[26].mxu1  ;;  %5348 = vmatpush3.bf16.msra.mxu1 %v3610_v54  ;;  %5343 = vmatprep.mubr.msk.bf16.mxu0 %vm5883_vm0, %v5882_v1  ;;  %v2296_v51 = vcombine.low %v6809_v32, %v6812_v24 }
 0x30a   : > { %v5649_v4 = vpop.eup %5648  ;;  %5656 = vpow2.f32 %v5041_v31  ;;  %v5274_v5 = vpop.f32.mrb[27].mxu0  ;;  %5349 = vmatprep.mubr.msk.bf16.mxu1 %vm5883_vm0, %v5882_v1  ;;  %5353 = vmatprep.subr.bf16.mxu0 %v5882_v1  ;;  %v2362_v31 = vpack.c.bf16 %v2314_v55, %v2314_v55  ;;  %v2363_v56 = vpack.c.bf16 %v2315_v45, %v2315_v45 }
 0x30b   : > { %v5280_v7 = vpop.f32.mrb[27].mxu1  ;;  %v5651_v0 = vpop.eup %5650  ;;  %v3161_v63 = vadd.f32 1.0, %v5649_v4  ;;  %5658 = vpow2.f32 %v5042_v43  ;;  %5359 = vmatprep.subr.bf16.mxu1 %v5882_v1  ;;  %v2304_v60 = vrot.slane %v2296_v51, %v6231_v62 }
 0x30c   : > { %v3162_v10 = vadd.f32 1.0, %v5651_v0  ;;  %v2272_v7 = vrot.slane %v2264_v50, %v6231_v62  ;;  %v3794_v11 = vsel %vm3286_vm2, %v2363_v56, 0 }
 0x30d   : > { %v5653_v61 = vpop.eup %5652  ;;  %5660 = vrcp.f32 %v3161_v63 }
 0x30e   : > { %v5655_v15 = vpop.eup %5654  ;;  %5662 = vrcp.f32 %v3162_v10  ;;  %v3209_v23 = vsel %vm6657_vm3, %v5653_v61, 0.0  ;;  %v3748_v61 = vsel %vm3286_vm2, %v2362_v31, 0 }
 0x30f   : > { %v2961_v42 = vpop.f32.mrb[28].mxu0  ;;  %v3007_v9 = vpop.f32.mrb[28].mxu1  ;;  %v3210_v2 = vsel %vm6657_vm3, %v5655_v15, 0.0  ;;  %v3237_v58 = vsel %vm2368_vm1, %v3209_v23, 0.0  ;;  %v3273_v12 = vpack.c.bf16 %v3209_v23, %v3209_v23  ;;  %v2316_v15 = vcombine.low %v2272_v7, %v2304_v60 }
 0x310   : > { %v5043_v18 = vmul.f32 -1.442695, %v2961_v42  ;;  %v5044_v19 = vmul.f32 -1.442695, %v3007_v9  ;;  %v5285_v20 = vpop.f32.mrb[29].mxu0  ;;  %v5291_v35 = vpop.f32.mrb[29].mxu1  ;;  %v3274_v21 = vpack.c.bf16 %v3210_v2, %v3210_v2  ;;  %3238 = vadd.xlane.f32.xlu0 %v3237_v58  ;;  %v2265_v23 = vcombine.high %v6803_v13, %v6806_v22 }
 0x311   : > { %v2964_v33 = vpop.f32.mrb[30].mxu0  ;;  %v3010_v38 = vpop.f32.mrb[30].mxu1  ;;  %v3240_v39 = vsel %vm2368_vm1, %v3210_v2, 0.0  ;;  %5344 = vmatmul.mubr.msk.bf16.vlgmr.msra.gmra.mrb[48].mxu0 %vm2368_vm1, %v3273_v12  ;;  %v2317_v42 = vcombine.high %v2272_v7, %v2304_v60  ;;  %v2364_v2 = vpack.c.bf16 %v2316_v15, %v2316_v15  ;;  %v2311_v12 = vrot.slane %v2297_v16, %v6231_v62 }
 0x312   : > { %5664 = vpow2.f32 %v5043_v18  ;;  %v5286_v28 = vpop.f32.mrb[31].mxu0  ;;  %v5292_v44 = vpop.f32.mrb[31].mxu1  ;;  %3241 = vadd.xlane.f32.xlu1 %v3240_v39  ;;  %5350 = vmatmul.mubr.msk.bf16.vlgmr.msra.gmra.mrb[48].mxu1 %vm2368_vm1, %v3274_v21  ;;  %v2279_v58 = vrot.slane %v2265_v23, %v6231_v62 }
 0x313   : > { %5666 = vpow2.f32 %v5044_v19  ;;  %5354 = vmatpush3.bf16.msra.mxu0 %v3656_v36  ;;  %5360 = vmatpush3.bf16.msra.mxu1 %v3702_v37  ;;  %v2365_v18 = vpack.c.bf16 %v2317_v42, %v2317_v42  ;;  %v3840_v62 = vsel %vm3286_vm2, %v2364_v2, 0 }
 0x314   : > { %v5657_v46 = vpop.eup %5656  ;;  %5355 = vmatprep.mubr.msk.bf16.mxu0 %vm5883_vm0, %v5882_v1  ;;  %5361 = vmatprep.mubr.msk.bf16.mxu1 %vm5883_vm0, %v5882_v1  ;;  %v2318_v38 = vcombine.low %v2279_v58, %v2311_v12  ;;  %v2319_v44 = vcombine.high %v2279_v58, %v2311_v12 }
 0x315   : > { %v5659_v48 = vpop.eup %5658  ;;  %v3163_v49 = vadd.f32 1.0, %v5657_v46  ;;  %5365 = vmatprep.subr.bf16.mxu0 %v5882_v1  ;;  %5371 = vmatprep.subr.bf16.mxu1 %v5882_v1  ;;  %v3886_v28 = vsel %vm3286_vm2, %v2365_v18, 0 }
 0x316   : > { %v3164_v53 = vadd.f32 1.0, %v5659_v48  ;;  %v2366_v37 = vpack.c.bf16 %v2318_v38, %v2318_v38  ;;  %v2367_v45 = vpack.c.bf16 %v2319_v44, %v2319_v44 }
 0x317   : > { %v5661_v54 = vpop.eup %5660  ;;  %5668 = vrcp.f32 %v3163_v49  ;;  %v3053_v27 = vpop.f32.mrb[32].mxu0 }
 0x318   : > { %v3099_v26 = vpop.f32.mrb[32].mxu1  ;;  %v5663_v43 = vpop.eup %5662  ;;  %5670 = vrcp.f32 %v3164_v53  ;;  %v5045_v34 = vmul.f32 -1.442695, %v3053_v27  ;;  %v3211_v5 = vsel %vm6657_vm3, %v5661_v54, 0.0  ;;  %v3932_v54 = vsel %vm3286_vm2, %v2366_v37, 0 }
 0x319   : > { %v5046_v40 = vmul.f32 -1.442695, %v3099_v26  ;;  %v5297_v57 = vpop.f32.mrb[33].mxu0  ;;  %v5303_v41 = vpop.f32.mrb[33].mxu1  ;;  %v3212_v4 = vsel %vm6657_vm3, %v5663_v43, 0.0  ;;  %v3243_v47 = vsel %vm2368_vm1, %v3211_v5, 0.0  ;;  %v3275_v52 = vpack.c.bf16 %v3211_v5, %v3211_v5 }
 0x31a   : > { %v3056_v3 = vpop.f32.mrb[34].mxu0  ;;  %v3102_v29 = vpop.f32.mrb[34].mxu1  ;;  %5672 = vpow2.f32 %v5045_v34  ;;  %v3246_v63 = vsel %vm2368_vm1, %v3212_v4, 0.0  ;;  %v3276_v59 = vpack.c.bf16 %v3212_v4, %v3212_v4  ;;  %3244 = vadd.xlane.f32.xlu0 %v3243_v47  ;;  %v3978_v27 = vsel %vm3286_vm2, %v2367_v45, 0 }
 0x31b   : > { %v5298_v30 = vpop.f32.mrb[35].mxu0  ;;  %v5304_v0 = vpop.f32.mrb[35].mxu1  ;;  %5674 = vpow2.f32 %v5046_v40  ;;  %3247 = vadd.xlane.f32.xlu1 %v3246_v63  ;;  %5356 = vmatmul.mubr.msk.bf16.vlgmr.msra.gmra.mrb[52].mxu0 %vm2368_vm1, %v3275_v52  ;;  %v4072_v3 = vsel %vm3286_vm2, %v534_v25, 0  ;;  %v535_v29 = vld [vmem:[#allocation7 + $0x4] sm:$0xf] }
 0x31c   : > { %v5665_v10 = vpop.eup %5664  ;;  %5362 = vmatmul.mubr.msk.bf16.vlgmr.msra.gmra.mrb[52].mxu1 %vm2368_vm1, %v3276_v59  ;;  %5366 = vmatpush3.bf16.msra.mxu0 %v3748_v61  ;;  %v4118_v4 = vsel %vm3286_vm2, %v535_v29, 0  ;;  %v536_v59 = vld [vmem:[#allocation7 + $0x8] sm:$0xf] }
 0x31d   : > { %v5667_v8 = vpop.eup %5666  ;;  %v3165_v14 = vadd.f32 1.0, %v5665_v10  ;;  %5372 = vmatpush3.bf16.msra.mxu1 %v3794_v11  ;;  %5367 = vmatprep.mubr.msk.bf16.mxu0 %vm5883_vm0, %v5882_v1  ;;  %v537_v11 = vld [vmem:[#allocation7 + $0xc] sm:$0xf]  ;;  %v4164_v42 = vsel %vm3286_vm2, %v536_v59, 0 }
 0x31e   : > { %v3166_v17 = vadd.f32 1.0, %v5667_v8  ;;  %5373 = vmatprep.mubr.msk.bf16.mxu1 %vm5883_vm0, %v5882_v1  ;;  %5377 = vmatprep.subr.bf16.mxu0 %v5882_v1  ;;  %v4210_v58 = vsel %vm3286_vm2, %v537_v11, 0 }
 0x31f   : > { %5676 = vrcp.f32 %v3165_v14  ;;  %5383 = vmatprep.subr.bf16.mxu1 %v5882_v1 }
 0x320   : > { %5678 = vrcp.f32 %v3166_v17 }
 0x321   : > { %v5669_v9 = vpop.eup %5668 }
 0x322   : > { %v5671_v6 = vpop.eup %5670  ;;  %v3213_v13 = vsel %vm6657_vm3, %v5669_v9, 0.0 }
 0x323   : > { %v3214_v19 = vsel %vm6657_vm3, %v5671_v6, 0.0  ;;  %v3249_v20 = vsel %vm2368_vm1, %v3213_v13, 0.0  ;;  %v3277_v35 = vpack.c.bf16 %v3213_v13, %v3213_v13 }
 0x324   : > { %v5673_v21 = vpop.eup %5672  ;;  %v3252_v22 = vsel %vm2368_vm1, %v3214_v19, 0.0  ;;  %v3278_v32 = vpack.c.bf16 %v3214_v19, %v3214_v19  ;;  %3250 = vadd.xlane.f32.xlu0 %v3249_v20  ;;  %v538_v19 = vld [vmem:[#allocation7 + $0x10] sm:$0xf] }
 0x325   : > { %v5675_v24 = vpop.eup %5674  ;;  %v3167_v33 = vadd.f32 1.0, %v5673_v21  ;;  %3253 = vadd.xlane.f32.xlu1 %v3252_v22  ;;  %5368 = vmatmul.mubr.msk.bf16.vlgmr.msra.gmra.mrb[56].mxu0 %vm2368_vm1, %v3277_v35  ;;  %v4256_v44 = vsel %vm3286_vm2, %v538_v19, 0 }
 0x326   : > { %v3168_v39 = vadd.f32 1.0, %v5675_v24  ;;  %5374 = vmatmul.mubr.msk.bf16.vlgmr.msra.gmra.mrb[56].mxu1 %vm2368_vm1, %v3278_v32  ;;  %5378 = vmatpush3.bf16.msra.mxu0 %v3840_v62  ;;  %v539_v32 = vld [vmem:[#allocation7 + $0x14] sm:$0xf] }
 0x327   : > { %5680 = vrcp.f32 %v3167_v33  ;;  %5384 = vmatpush3.bf16.msra.mxu1 %v3886_v28  ;;  %5379 = vmatprep.mubr.msk.bf16.mxu0 %vm5883_vm0, %v5882_v1 }
 0x328   : > { %5682 = vrcp.f32 %v3168_v39  ;;  %5385 = vmatprep.mubr.msk.bf16.mxu1 %vm5883_vm0, %v5882_v1  ;;  %5389 = vmatprep.subr.bf16.mxu0 %v5882_v1 }
 0x329   : > { %v5677_v36 = vpop.eup %5676  ;;  %5395 = vmatprep.subr.bf16.mxu1 %v5882_v1 }
 0x32a   : > { %v5679_v55 = vpop.eup %5678  ;;  %v3215_v46 = vsel %vm6657_vm3, %v5677_v36, 0.0 }
 0x32b   : > { %v3216_v48 = vsel %vm6657_vm3, %v5679_v55, 0.0  ;;  %v3255_v49 = vsel %vm2368_vm1, %v3215_v46, 0.0  ;;  %v3279_v50 = vpack.c.bf16 %v3215_v46, %v3215_v46  ;;  %v4302_v55 = vsel %vm3286_vm2, %v539_v32, 0 }
 0x32c   : > { %v3258_v51 = vsel %vm2368_vm1, %v3216_v48, 0.0  ;;  %v3280_v53 = vpack.c.bf16 %v3216_v48, %v3216_v48  ;;  %3256 = vadd.xlane.f32.xlu0 %v3255_v49 }
 0x32d   : > { %3259 = vadd.xlane.f32.xlu1 %v3258_v51  ;;  %5380 = vmatmul.mubr.msk.bf16.vlgmr.msra.gmra.mrb[60].mxu0 %vm2368_vm1, %v3279_v50  ;;  %v540_v50 = vld [vmem:[#allocation7 + $0x18] sm:$0xf] }
 0x32e   : > { %5386 = vmatmul.mubr.msk.bf16.vlgmr.msra.gmra.mrb[60].mxu1 %vm2368_vm1, %v3280_v53  ;;  %5390 = vmatpush3.bf16.msra.mxu0 %v3932_v54 }
 0x32f   : > { %5396 = vmatpush3.bf16.msra.mxu1 %v3978_v27  ;;  %5391 = vmatprep.mubr.msk.bf16.mxu0 %vm5883_vm0, %v5882_v1 }
 0x330   : > { %5397 = vmatprep.mubr.msk.bf16.mxu1 %vm5883_vm0, %v5882_v1  ;;  %5401 = vmatprep.subr.bf16.mxu0 %v5882_v1 }
 0x331   : > { %v5681_v26 = vpop.eup %5680  ;;  %5407 = vmatprep.subr.bf16.mxu1 %v5882_v1 }
 0x332   : > { %v5683_v31 = vpop.eup %5682  ;;  %v3217_v43 = vsel %vm6657_vm3, %v5681_v26, 0.0  ;;  %v541_v26 = vld [vmem:[#allocation7 + $0x1c] sm:$0xf] }
 0x333   : > { %v3218_v34 = vsel %vm6657_vm3, %v5683_v31, 0.0  ;;  %v3261_v40 = vsel %vm2368_vm1, %v3217_v43, 0.0  ;;  %v3281_v57 = vpack.c.bf16 %v3217_v43, %v3217_v43  ;;  %v4394_v29 = vsel %vm3286_vm2, %v541_v26, 0 }
 0x334   : > { %v3264_v41 = vsel %vm2368_vm1, %v3218_v34, 0.0  ;;  %v3282_v56 = vpack.c.bf16 %v3218_v34, %v3218_v34  ;;  %3262 = vadd.xlane.f32.xlu0 %v3261_v40 }
 0x335   : > { %3265 = vadd.xlane.f32.xlu1 %v3264_v41  ;;  %5392 = vmatmul.mubr.msk.bf16.vlgmr.msra.gmra.mrb[64].mxu0 %vm2368_vm1, %v3281_v57 }
 0x336   : > { %5398 = vmatmul.mubr.msk.bf16.vlgmr.msra.gmra.mrb[64].mxu1 %vm2368_vm1, %v3282_v56  ;;  %5403 = vmatprep.mubr.msk.bf16.mxu0 %vm5883_vm0, %v5882_v1  ;;  %v4348_v56 = vsel %vm3286_vm2, %v540_v50, 0 }
 0x337   : > { %5409 = vmatprep.mubr.msk.bf16.mxu1 %vm5883_vm0, %v5882_v1  ;;  %5402 = vmatpush3.bf16.msra.mxu0 %v4072_v3 }
 0x338   : > { %5413 = vmatprep.subr.bf16.mxu0 %v5882_v1  ;;  %5408 = vmatpush3.bf16.msra.mxu1 %v4118_v4 }
 0x339   : > { %5419 = vmatprep.subr.bf16.mxu1 %v5882_v1 }
 0x37c   : > { %v3221_v5 = vpop.xlane.xlu1 %3220 }
 0x37d   : > { %v3224_v7 = vpop.xlane.xlu0 %3223  ;;  %5684 = vrcp.f32 %v3221_v5 }
 0x37e   : > { %5686 = vrcp.f32 %v3224_v7 }
 0x387   : > { %v5685_v30 = vpop.eup %5684 }
 0x388   : > { %v5687_v47 = vpop.eup %5686 }
 0x38b   : > { %v3227_v60 = vpop.xlane.xlu0 %3226 }
 0x38c   : > { %v3230_v0 = vpop.xlane.xlu1 %3229  ;;  %5688 = vrcp.f32 %v3227_v60 }
 0x38d   : > { %5690 = vrcp.f32 %v3230_v0 }
 0x393   : > { %v3233_v12 = vpop.xlane.xlu0 %3232 }
 0x394   : > { %v3236_v6 = vpop.xlane.xlu1 %3235  ;;  %5692 = vrcp.f32 %v3233_v12 }
 0x395   : > { %5694 = vrcp.f32 %v3236_v6  ;;  %v545_v6 = vld [vmem:[#allocation7 + $0x2c] sm:$0xf] }
 0x396   : > { %v5689_v13 = vpop.eup %5688 }
 0x397   : > { %v5691_v20 = vpop.eup %5690 }
 0x39d   : > { %v3239_v46 = vpop.xlane.xlu0 %3238 }
 0x39e   : > { %v5693_v48 = vpop.eup %5692  ;;  %5696 = vrcp.f32 %v3239_v46 }
 0x39f   : > { %v3242_v45 = vpop.xlane.xlu1 %3241  ;;  %v5695_v51 = vpop.eup %5694 }
 0x3a0   : > { %5698 = vrcp.f32 %v3242_v45 }
 0x3a7   : > { %v3245_v5 = vpop.xlane.xlu0 %3244 }
 0x3a8   : > { %v3248_v4 = vpop.xlane.xlu1 %3247  ;;  %v5697_v7 = vpop.eup %5696 }
 0x3a9   : > { %5700 = vrcp.f32 %v3248_v4 }
 0x3aa   : > { %v5699_v0 = vpop.eup %5698  ;;  %5702 = vrcp.f32 %v3245_v5  ;;  %v548_v5 = vld [vmem:[#allocation7 + $0x38] sm:$0xf] }
 0x3c3   : > { %v3324_v63 = vpop.f32.mrb[36].mxu0 }
 0x3c4   : > { %v4036_v52 = vmul.f32 %v5685_v30, %v3324_v63  ;;  %v3370_v10 = vpop.f32.mrb[36].mxu1  ;;  %v5309_v61 = vpop.f32.mrb[37].mxu0  ;;  %v542_v30 = vld [vmem:[#allocation7 + $0x20] sm:$0xf] }
 0x3c5   : > { %v4037_v8 = vmul.f32 %v5687_v47, %v3370_v10  ;;  %v5315_v14 = vpop.f32.mrb[37].mxu1  ;;  %v3327_v15 = vpop.f32.mrb[38].mxu0 }
 0x3c6   : > { %v4052_v23 = vpack.c.bf16 %v4036_v52, %v4036_v52  ;;  %v3373_v16 = vpop.f32.mrb[38].mxu1  ;;  %v5310_v17 = vpop.f32.mrb[39].mxu0  ;;  %v543_v52 = vld [vmem:[#allocation7 + $0x24] sm:$0xf] }
 0x3c7   : > { %v4053_v9 = vpack.c.bf16 %v4037_v8, %v4037_v8  ;;  %v5316_v2 = vpop.f32.mrb[39].mxu1 }
 0x3c8   : > { %5404 = vmatmul.mubr.msk.bf16.vlgmr.msra.gmra.mrb[68].mxu0 %vm2368_vm1, %v4052_v23  ;;  %v4440_v23 = vsel %vm3286_vm2, %v542_v30, 0  ;;  %v3254_v2 = vpop.xlane.xlu1 %3253 }
 0x3c9   : > { %5410 = vmatmul.mubr.msk.bf16.vlgmr.msra.gmra.mrb[68].mxu1 %vm2368_vm1, %v4053_v9  ;;  %5414 = vmatpush3.bf16.msra.mxu0 %v4164_v42  ;;  %v4486_v42 = vsel %vm3286_vm2, %v543_v52, 0  ;;  %v3251_v9 = vpop.xlane.xlu0 %3250 }
 0x3ca   : > { %5420 = vmatpush3.bf16.msra.mxu1 %v4210_v58  ;;  %5415 = vmatprep.mubr.msk.bf16.mxu0 %vm5883_vm0, %v5882_v1  ;;  %5704 = vrcp.f32 %v3251_v9  ;;  %v5701_v58 = vpop.eup %5700 }
 0x3cb   : > { %5421 = vmatprep.mubr.msk.bf16.mxu1 %vm5883_vm0, %v5882_v1  ;;  %5425 = vmatprep.subr.bf16.mxu0 %v5882_v1  ;;  %5706 = vrcp.f32 %v3254_v2 }
 0x3cc   : > { %5431 = vmatprep.subr.bf16.mxu1 %v5882_v1 }
 0x3d2   : > { %v3416_v18 = vpop.f32.mrb[40].mxu0 }
 0x3d3   : > { %v4038_v35 = vmul.f32 %v5689_v13, %v3416_v18  ;;  %v3462_v21 = vpop.f32.mrb[40].mxu1  ;;  %v5321_v22 = vpop.f32.mrb[41].mxu0 }
 0x3d4   : > { %v4039_v24 = vmul.f32 %v5691_v20, %v3462_v21  ;;  %v5327_v33 = vpop.f32.mrb[41].mxu1  ;;  %v3419_v62 = vpop.f32.mrb[42].mxu0 }
 0x3d5   : > { %v4054_v38 = vpack.c.bf16 %v4038_v35, %v4038_v35  ;;  %v3465_v39 = vpop.f32.mrb[42].mxu1  ;;  %v5322_v28 = vpop.f32.mrb[43].mxu0  ;;  %v544_v35 = vld [vmem:[#allocation7 + $0x28] sm:$0xf] }
 0x3d6   : > { %v4055_v36 = vpack.c.bf16 %v4039_v24, %v4039_v24  ;;  %v5328_v37 = vpop.f32.mrb[43].mxu1  ;;  %v5703_v13 = vpop.eup %5702 }
 0x3d7   : > { %5416 = vmatmul.mubr.msk.bf16.vlgmr.msra.gmra.mrb[72].mxu0 %vm2368_vm1, %v4054_v38  ;;  %v4578_v38 = vsel %vm3286_vm2, %v545_v6, 0  ;;  %v3257_v39 = vpop.xlane.xlu0 %3256  ;;  %v3260_v37 = vpop.xlane.xlu1 %3259 }
 0x3d8   : > { %5422 = vmatmul.mubr.msk.bf16.vlgmr.msra.gmra.mrb[72].mxu1 %vm2368_vm1, %v4055_v36  ;;  %5426 = vmatpush3.bf16.msra.mxu0 %v4256_v44  ;;  %v4532_v36 = vsel %vm3286_vm2, %v544_v35, 0  ;;  %5708 = vrcp.f32 %v3257_v39 }
 0x3d9   : > { %5432 = vmatpush3.bf16.msra.mxu1 %v4302_v55  ;;  %5427 = vmatprep.mubr.msk.bf16.mxu0 %vm5883_vm0, %v5882_v1  ;;  %5710 = vrcp.f32 %v3260_v37  ;;  %v5705_v55 = vpop.eup %5704 }
 0x3da   : > { %v3508_v49 = vpop.f32.mrb[44].mxu0  ;;  %5433 = vmatprep.mubr.msk.bf16.mxu1 %vm5883_vm0, %v5882_v1  ;;  %5437 = vmatprep.subr.bf16.mxu0 %v5882_v1 }
 0x3db   : > { %v4040_v53 = vmul.f32 %v5693_v48, %v3508_v49  ;;  %v3554_v54 = vpop.f32.mrb[44].mxu1  ;;  %v5333_v27 = vpop.f32.mrb[45].mxu0  ;;  %5443 = vmatprep.subr.bf16.mxu1 %v5882_v1  ;;  %v546_v48 = vld [vmem:[#allocation7 + $0x30] sm:$0xf] }
 0x3dc   : > { %v4041_v31 = vmul.f32 %v5695_v51, %v3554_v54  ;;  %v5339_v43 = vpop.f32.mrb[45].mxu1  ;;  %v3511_v34 = vpop.f32.mrb[46].mxu0  ;;  %v547_v54 = vld [vmem:[#allocation7 + $0x34] sm:$0xf] }
 0x3dd   : > { %v4056_v40 = vpack.c.bf16 %v4040_v53, %v4040_v53  ;;  %v3557_v57 = vpop.f32.mrb[46].mxu1  ;;  %v5334_v41 = vpop.f32.mrb[47].mxu0 }
 0x3de   : > { %v4057_v25 = vpack.c.bf16 %v4041_v31, %v4041_v31  ;;  %v5340_v3 = vpop.f32.mrb[47].mxu1  ;;  %v3263_v46 = vpop.xlane.xlu0 %3262  ;;  %v4624_v57 = vsel %vm3286_vm2, %v546_v48, 0 }
 0x3df   : > { %5428 = vmatmul.mubr.msk.bf16.vlgmr.msra.gmra.mrb[76].mxu0 %vm2368_vm1, %v4056_v40  ;;  %v5707_v49 = vpop.eup %5706  ;;  %v3266_v41 = vpop.xlane.xlu1 %3265  ;;  %v4670_v3 = vsel %vm3286_vm2, %v547_v54, 0  ;;  %5712 = vrcp.f32 %v3263_v46 }
 0x3e0   : > { %5434 = vmatmul.mubr.msk.bf16.vlgmr.msra.gmra.mrb[76].mxu1 %vm2368_vm1, %v4057_v25  ;;  %5438 = vmatpush3.bf16.msra.mxu0 %v4348_v56  ;;  %5714 = vrcp.f32 %v3266_v41 }
 0x3e1   : > { %5444 = vmatpush3.bf16.msra.mxu1 %v4394_v29  ;;  %5439 = vmatprep.mubr.msk.bf16.mxu0 %vm5883_vm0, %v5882_v1 }
 0x3e2   : > { %5445 = vmatprep.mubr.msk.bf16.mxu1 %vm5883_vm0, %v5882_v1  ;;  %5449 = vmatprep.subr.bf16.mxu0 %v5882_v1  ;;  %v5709_v29 = vpop.eup %5708 }
 0x3e3   : > { %5455 = vmatprep.subr.bf16.mxu1 %v5882_v1 }
 0x3e4   : > { %v3600_v60 = vpop.f32.mrb[48].mxu0 }
 0x3e5   : > { %v4042_v63 = vmul.f32 %v5697_v7, %v3600_v60  ;;  %v3646_v59 = vpop.f32.mrb[48].mxu1  ;;  %v5345_v47 = vpop.f32.mrb[49].mxu0 }
 0x3e6   : > { %v4043_v10 = vmul.f32 %v5699_v0, %v3646_v59  ;;  %v5351_v61 = vpop.f32.mrb[49].mxu1  ;;  %v3603_v11 = vpop.f32.mrb[50].mxu0 }
 0x3e7   : > { %v4058_v8 = vpack.c.bf16 %v4042_v63, %v4042_v63  ;;  %v3649_v14 = vpop.f32.mrb[50].mxu1  ;;  %v5346_v15 = vpop.f32.mrb[51].mxu0  ;;  %v549_v63 = vld [vmem:[#allocation7 + $0x3c] sm:$0xf] }
 0x3e8   : > { %v4059_v16 = vpack.c.bf16 %v4043_v10, %v4043_v10  ;;  %v5352_v17 = vpop.f32.mrb[51].mxu1  ;;  %v5711_v7 = vpop.eup %5710 }
 0x3e9   : > { %5440 = vmatmul.mubr.msk.bf16.vlgmr.msra.gmra.mrb[80].mxu0 %vm2368_vm1, %v4058_v8  ;;  %v4716_v8 = vsel %vm3286_vm2, %v548_v5, 0 }
 0x3ea   : > { %5446 = vmatmul.mubr.msk.bf16.vlgmr.msra.gmra.mrb[80].mxu1 %vm2368_vm1, %v4059_v16  ;;  %5450 = vmatpush3.bf16.msra.mxu0 %v4440_v23  ;;  %v4762_v23 = vsel %vm3286_vm2, %v549_v63, 0  ;;  %v5713_v16 = vpop.eup %5712 }
 0x3eb   : > { %5456 = vmatpush3.bf16.msra.mxu1 %v4486_v42  ;;  %5451 = vmatprep.mubr.msk.bf16.mxu0 %vm5883_vm0, %v5882_v1  ;;  %v5715_v42 = vpop.eup %5714 }
 0x3ec   : > { %5457 = vmatprep.mubr.msk.bf16.mxu1 %vm5883_vm0, %v5882_v1  ;;  %5461 = vmatprep.subr.bf16.mxu0 %v5882_v1 }
 0x3ed   : > { %5467 = vmatprep.subr.bf16.mxu1 %v5882_v1 }
 0x3ee   : > { %v3692_v18 = vpop.f32.mrb[52].mxu0 }
 0x3ef   : > { %v3738_v12 = vpop.f32.mrb[52].mxu1  ;;  %v4044_v21 = vmul.f32 %v5703_v13, %v3692_v18  ;;  %v5357_v22 = vpop.f32.mrb[53].mxu0 }
 0x3f0   : > { %v4045_v19 = vmul.f32 %v5701_v58, %v3738_v12  ;;  %v5363_v20 = vpop.f32.mrb[53].mxu1  ;;  %v3695_v33 = vpop.f32.mrb[54].mxu0 }
 0x3f1   : > { %v3741_v32 = vpop.f32.mrb[54].mxu1  ;;  %v4060_v28 = vpack.c.bf16 %v4044_v21, %v4044_v21  ;;  %v5358_v44 = vpop.f32.mrb[55].mxu0 }
 0x3f2   : > { %v4061_v24 = vpack.c.bf16 %v4045_v19, %v4045_v19  ;;  %v5364_v62 = vpop.f32.mrb[55].mxu1 }
 0x3f3   : > { %5452 = vmatmul.mubr.msk.bf16.vlgmr.msra.gmra.mrb[84].mxu0 %vm2368_vm1, %v4060_v28 }
 0x3f4   : > { %5458 = vmatmul.mubr.msk.bf16.vlgmr.msra.gmra.mrb[84].mxu1 %vm2368_vm1, %v4061_v24  ;;  %5462 = vmatpush3.bf16.msra.mxu0 %v4532_v36 }
 0x3f5   : > { %5468 = vmatpush3.bf16.msra.mxu1 %v4578_v38  ;;  %5463 = vmatprep.mubr.msk.bf16.mxu0 %vm5883_vm0, %v5882_v1 }
 0x3f6   : > { %5469 = vmatprep.mubr.msk.bf16.mxu1 %vm5883_vm0, %v5882_v1  ;;  %5473 = vmatprep.subr.bf16.mxu0 %v5882_v1 }
 0x3f7   : > { %5479 = vmatprep.subr.bf16.mxu1 %v5882_v1 }
 0x3f8   : > { %v3784_v45 = vpop.f32.mrb[56].mxu0 }
 0x3f9   : > { %v4046_v50 = vmul.f32 %v5705_v55, %v3784_v45  ;;  %v3830_v51 = vpop.f32.mrb[56].mxu1  ;;  %v5369_v53 = vpop.f32.mrb[57].mxu0 }
 0x3fa   : > { %v4047_v27 = vmul.f32 %v5707_v49, %v3830_v51  ;;  %v5375_v26 = vpop.f32.mrb[57].mxu1  ;;  %v3787_v31 = vpop.f32.mrb[58].mxu0 }
 0x3fb   : > { %v4062_v43 = vpack.c.bf16 %v4046_v50, %v4046_v50  ;;  %v3833_v34 = vpop.f32.mrb[58].mxu1  ;;  %v5370_v40 = vpop.f32.mrb[59].mxu0 }
 0x3fc   : > { %v4063_v56 = vpack.c.bf16 %v4047_v27, %v4047_v27  ;;  %v5376_v25 = vpop.f32.mrb[59].mxu1 }
 0x3fd   : > { %5464 = vmatmul.mubr.msk.bf16.vlgmr.msra.gmra.mrb[88].mxu0 %vm2368_vm1, %v4062_v43 }
 0x3fe   : > { %5470 = vmatmul.mubr.msk.bf16.vlgmr.msra.gmra.mrb[88].mxu1 %vm2368_vm1, %v4063_v56  ;;  %5474 = vmatpush3.bf16.msra.mxu0 %v4624_v57 }
 0x3ff   : > { %5480 = vmatpush3.bf16.msra.mxu1 %v4670_v3  ;;  %5475 = vmatprep.mubr.msk.bf16.mxu0 %vm5883_vm0, %v5882_v1 }
 0x400   : > { %v3876_v4 = vpop.f32.mrb[60].mxu0  ;;  %5481 = vmatprep.mubr.msk.bf16.mxu1 %vm5883_vm0, %v5882_v1  ;;  %5485 = vmatprep.subr.bf16.mxu0 %v5882_v1 }
 0x401   : > { %v4048_v60 = vmul.f32 %v5709_v29, %v3876_v4  ;;  %v3922_v30 = vpop.f32.mrb[60].mxu1  ;;  %v5381_v0 = vpop.f32.mrb[61].mxu0  ;;  %5491 = vmatprep.subr.bf16.mxu1 %v5882_v1 }
 0x402   : > { %v4049_v59 = vmul.f32 %v5711_v7, %v3922_v30  ;;  %v5387_v47 = vpop.f32.mrb[61].mxu1  ;;  %v3879_v52 = vpop.f32.mrb[62].mxu0 }
 0x403   : > { %v4064_v10 = vpack.c.bf16 %v4048_v60, %v4048_v60  ;;  %v3925_v61 = vpop.f32.mrb[62].mxu1  ;;  %v5382_v11 = vpop.f32.mrb[63].mxu0 }
 0x404   : > { %v4065_v14 = vpack.c.bf16 %v4049_v59, %v4049_v59  ;;  %v5388_v15 = vpop.f32.mrb[63].mxu1 }
 0x405   : > { %5476 = vmatmul.mubr.msk.bf16.vlgmr.msra.gmra.mrb[92].mxu0 %vm2368_vm1, %v4064_v10 }
 0x406   : > { %5482 = vmatmul.mubr.msk.bf16.vlgmr.msra.gmra.mrb[92].mxu1 %vm2368_vm1, %v4065_v14  ;;  %5486 = vmatpush3.bf16.msra.mxu0 %v4716_v8 }
 0x407   : > { %5492 = vmatpush3.bf16.msra.mxu1 %v4762_v23  ;;  %5487 = vmatprep.mubr.msk.bf16.mxu0 %vm5883_vm0, %v5882_v1 }
 0x408   : > { %v3968_v17 = vpop.f32.mrb[64].mxu0  ;;  %5493 = vmatprep.mubr.msk.bf16.mxu1 %vm5883_vm0, %v5882_v1 }
 0x409   : > { %v4050_v9 = vmul.f32 %v5713_v16, %v3968_v17  ;;  %v4014_v2 = vpop.f32.mrb[64].mxu1  ;;  %v5393_v58 = vpop.f32.mrb[65].mxu0 }
 0x40a   : > { %v4051_v12 = vmul.f32 %v5715_v42, %v4014_v2  ;;  %v5399_v6 = vpop.f32.mrb[65].mxu1  ;;  %v3971_v13 = vpop.f32.mrb[66].mxu0 }
 0x40b   : > { %v4066_v18 = vpack.c.bf16 %v4050_v9, %v4050_v9  ;;  %v4017_v19 = vpop.f32.mrb[66].mxu1  ;;  %v5394_v20 = vpop.f32.mrb[67].mxu0 }
 0x40c   : > { %v4067_v35 = vpack.c.bf16 %v4051_v12, %v4051_v12  ;;  %v5400_v21 = vpop.f32.mrb[67].mxu1 }
 0x40d   : > { %5488 = vmatmul.mubr.msk.bf16.vlgmr.msra.gmra.mrb[96].mxu0 %vm2368_vm1, %v4066_v18 }
 0x40e   : > { %5494 = vmatmul.mubr.msk.bf16.vlgmr.msra.gmra.mrb[96].mxu1 %vm2368_vm1, %v4067_v35 }
 0x49b   : > { %v4108_v22 = vpop.f32.mrb[68].mxu0 }
 0x49c   : > { %v4154_v32 = vpop.f32.mrb[68].mxu1  ;;  %v5405_v24 = vpop.f32.mrb[69].mxu0 }
 0x49d   : > { %v4804_v1 = vadd.f32 %v4154_v32, %v4108_v22  ;;  %v5411_v33 = vpop.f32.mrb[69].mxu1  ;;  %v4111_v62 = vpop.f32.mrb[70].mxu0 }
 0x49e   : > { %v4157_v38 = vpop.f32.mrb[70].mxu1  ;;  %v5406_v39 = vpop.f32.mrb[71].mxu0 }
 0x49f   : > { %v5412_v28 = vpop.f32.mrb[71].mxu1 }
 0x4aa   : > { %v4200_v44 = vpop.f32.mrb[72].mxu0 }
 0x4ab   : > { %v4805_v36 = vadd.f32 %v4804_v1, %v4200_v44  ;;  %v4246_v37 = vpop.f32.mrb[72].mxu1  ;;  %v5417_v55 = vpop.f32.mrb[73].mxu0  ;;  %v5079_v44 = vld [vmem:[%s7027_s4] ss:$0 sm:$0xff] }
 0x4ac   : > { %v5423_v46 = vpop.f32.mrb[73].mxu1  ;;  %v4203_v45 = vpop.f32.mrb[74].mxu0 }
 0x4ad   : > { %v4806_v48 = vadd.f32 %v4805_v36, %v4246_v37  ;;  %v4249_v49 = vpop.f32.mrb[74].mxu1  ;;  %v5418_v50 = vpop.f32.mrb[75].mxu0 }
 0x4ae   : > { %v5424_v51 = vpop.f32.mrb[75].mxu1 }
 0x4b2   : > { %v4292_v53 = vpop.f32.mrb[76].mxu0 }
 0x4b3   : > { %v4807_v54 = vadd.f32 %v4806_v48, %v4292_v53  ;;  %v4338_v27 = vpop.f32.mrb[76].mxu1  ;;  %v5429_v26 = vpop.f32.mrb[77].mxu0 }
 0x4b4   : > { %v5435_v31 = vpop.f32.mrb[77].mxu1  ;;  %v4295_v43 = vpop.f32.mrb[78].mxu0 }
 0x4b5   : > { %v4808_v34 = vadd.f32 %v4807_v54, %v4338_v27  ;;  %v4341_v40 = vpop.f32.mrb[78].mxu1  ;;  %v5430_v57 = vpop.f32.mrb[79].mxu0 }
 0x4b6   : > { %v5436_v41 = vpop.f32.mrb[79].mxu1 }
 0x4bc   : > { %v4384_v56 = vpop.f32.mrb[80].mxu0 }
 0x4bd   : > { %v4809_v25 = vadd.f32 %v4808_v34, %v4384_v56  ;;  %v4430_v3 = vpop.f32.mrb[80].mxu1  ;;  %v5441_v29 = vpop.f32.mrb[81].mxu0 }
 0x4be   : > { %v5447_v4 = vpop.f32.mrb[81].mxu1  ;;  %v4387_v5 = vpop.f32.mrb[82].mxu0 }
 0x4bf   : > { %v4810_v7 = vadd.f32 %v4809_v25, %v4430_v3  ;;  %v4433_v60 = vpop.f32.mrb[82].mxu1  ;;  %v5442_v30 = vpop.f32.mrb[83].mxu0 }
 0x4c0   : > { %v5448_v0 = vpop.f32.mrb[83].mxu1 }
 0x4c6   : > { %v4476_v59 = vpop.f32.mrb[84].mxu0 }
 0x4c7   : > { %v4522_v63 = vpop.f32.mrb[84].mxu1  ;;  %v4811_v52 = vadd.f32 %v4810_v7, %v4476_v59  ;;  %v5453_v10 = vpop.f32.mrb[85].mxu0 }
 0x4c8   : > { %v5459_v47 = vpop.f32.mrb[85].mxu1  ;;  %v4479_v11 = vpop.f32.mrb[86].mxu0 }
 0x4c9   : > { %v4525_v61 = vpop.f32.mrb[86].mxu1  ;;  %v4812_v14 = vadd.f32 %v4811_v52, %v4522_v63  ;;  %v5454_v15 = vpop.f32.mrb[87].mxu0 }
 0x4ca   : > { %v5460_v8 = vpop.f32.mrb[87].mxu1 }
 0x4d0   : > { %v4568_v23 = vpop.f32.mrb[88].mxu0 }
 0x4d1   : > { %v4813_v16 = vadd.f32 %v4812_v14, %v4568_v23  ;;  %v4614_v17 = vpop.f32.mrb[88].mxu1  ;;  %v5465_v42 = vpop.f32.mrb[89].mxu0 }
 0x4d2   : > { %v5471_v9 = vpop.f32.mrb[89].mxu1  ;;  %v4571_v2 = vpop.f32.mrb[90].mxu0 }
 0x4d3   : > { %v4814_v58 = vadd.f32 %v4813_v16, %v4614_v17  ;;  %v4617_v12 = vpop.f32.mrb[90].mxu1  ;;  %v5466_v6 = vpop.f32.mrb[91].mxu0 }
 0x4d4   : > { %v5472_v13 = vpop.f32.mrb[91].mxu1 }
 0x4d8   : > { %v4660_v18 = vpop.f32.mrb[92].mxu0 }
 0x4d9   : > { %v4815_v19 = vadd.f32 %v4814_v58, %v4660_v18  ;;  %v4706_v20 = vpop.f32.mrb[92].mxu1  ;;  %v5477_v35 = vpop.f32.mrb[93].mxu0 }
 0x4da   : > { %v5483_v21 = vpop.f32.mrb[93].mxu1  ;;  %v4663_v22 = vpop.f32.mrb[94].mxu0 }
 0x4db   : > { %v4816_v32 = vadd.f32 %v4815_v19, %v4706_v20  ;;  %v4709_v24 = vpop.f32.mrb[94].mxu1  ;;  %v5478_v1 = vpop.f32.mrb[95].mxu0 }
 0x4dc   : > { %v5484_v33 = vpop.f32.mrb[95].mxu1 }
 0x4e0   : > { %v4752_v62 = vpop.f32.mrb[96].mxu0 }
 0x4e1   : > { %v4817_v38 = vadd.f32 %v4816_v32, %v4752_v62  ;;  %v4798_v39 = vpop.f32.mrb[96].mxu1  ;;  %v5489_v28 = vpop.f32.mrb[97].mxu0 }
 0x4e2   : > { %v5495_v36 = vpop.f32.mrb[97].mxu1  ;;  %v4755_v37 = vpop.f32.mrb[98].mxu0 }
 0x4e3   : > { %v4818_v55 = vadd.f32 %v4817_v38, %v4798_v39  ;;  %v4801_v46 = vpop.f32.mrb[98].mxu1  ;;  %v5490_v45 = vpop.f32.mrb[99].mxu0 }
 0x4e4   : > { %v5496_v48 = vpop.f32.mrb[99].mxu1 }
 0x4e5   : > { %v4826_v49 = vadd.f32 %v5079_v44, %v4818_v55 }
 0x4e7   : > { %4827 = vst [vmem:[%s268_s7] sm:$0xff] %v4826_v49 }
 0x4e8   : > { %5815 = shalt.err (!%p5812_p2)
}
 0x4e9   : > { %s5816_s14 = scalar_lea.hbm %s6979_s9, 128  ;;  %s5820_s10 = scalar_lea.hbm %s7028_s5, 256 }
 0x4ea   : > { %p5817_p13 = scmp.ne.s32.totalorder %s6979_s9, %s5816_s14  ;;  %p5821_p4 = scmp.lt.u32.totalorder %s6979_s9, %s7028_s5 }
 0x4eb   : > { %p5822_p7 = scmp.lt.u32.totalorder %s5820_s10, %s5816_s14  ;;  %p5824_p11 = scmp.lt.u32.totalorder %s5816_s14, %s6979_s9 }
 0x4ec   : > { %p5818_p6 = pnand %p5817_p13, %p7044_p0 }
 0x4ed   : > { %p5823_p8 = por %p5822_p7, %p5821_p4 }
 0x4ee   : > { %p5819_p10 = pneg %p5818_p6 }
 0x4ef   : > { %p5825_p1 = por %p5824_p11, %p5823_p8 }
 0x4f1   : > { %p5826_p3 = pnand %p5825_p1, %p5819_p10 }
 0x4f3   : > { %5829 = shalt.err (!%p5826_p3)
}
 0x4f4   : > { %5507 = dma.vmem_to_hbm [thread:$0]  (%p7044_p0), %s6981_s6, 128, %s6979_s9, %s4829_s11  }
 0x4f5 PF: > { %s4854_s13 = sand.u32 1, %s5860_s18   ;;  %p7045_p5 = scmp.ne.s32.totalorder %s7033_s25, 0 }
 0x4f6   : > { %p7046_p9 = scmp.ge.s32.totalorder %s5872_s21, 2  ;;  %s4855_s7 = scalar_lea.sflag [#allocation4], %s4854_s13 }
 0x4f8   : > { %p5521_p12 = pnand %p7046_p9, %p7045_p5 }
 0x4fa   : > { %5855 = dma.done.wait (!%p5521_p12), %s4855_s7, 128  }
 0x4fb   : > { %5857 = vsyncadd (!%p5521_p12), %s4855_s7, 4294967168  ;;  %p19_p2 = scmp.ge.s32.totalorder %s6042_s16, 4   ;;  %s7047_s18 = smov %s5864_s19 }
 0x4fc   : > { %s7048_s19 = smov %s5868_s20  ;;  %s7049_s20 = smov %s6051_s27 }
 0x4fd   : > { %s7050_s21 = smov %s6042_s16  ;;  %21 = sbr.rel (!%p19_p2) target bundleno = 6 (0x6), region = 93 }
 0x504   :  { %4860 = vsyncpa [#allocation3], 1 }
 0x505   :  { %4862 = vsyncpa [#allocation3 + $0x1], 1 }
 0x506   :  { %4863 = vsyncpa [#allocation6], 1 }
 0x507   :  { %4864 = vsyncpa [#allocation4], 1 }
 0x508   :  { %4866 = vsyncpa [#allocation4 + $0x1], 1 }

</bundles_post_ra>
